<compile_context>
chip_gen: v6e
topology: v6e:2x2x1
jax: 0.10.0
libtpu: 0.0.40
codegen_flags: <defaults>
</compile_context>

<pallas_src>
import functools
import math

import jax
import jax.numpy as jnp
from jax import lax
from jax.experimental import pallas as pl
from jax.experimental.pallas import tpu as pltpu

# ----------------------------- configuration -------------------------------
GENERAL = dict(use_lightcurves=True, use_lightcurves_err=False,
               use_metadata=True, use_features=False)
LC_CFG = dict(embedding_size=32, num_heads=4, ffn_size=64, num_layers=1,
              num_bands=2, seq_len=8, Tmax=1500.0, num_harmonics=8)
FT_CFG = dict(embedding_size=32, num_heads=4, ffn_size=64, num_layers=1,
              num_features=6)
PROJ_DIM = 128
APPROX_RECIP = True   # exact-reciprocal toggle for parity tests


# ------------- Pallas kernel: both encoder towers, one launch ---------------
def _towers_kernel(num_layers, num_heads, head_dim, batch, seq, b_out,
                   x_ref, am_ref, wqkv_ref, bqkv_ref, wo_ref, w1_ref, w2_ref,
                   ep_ref, fp_ref, wproj_ref, o_ref):
    """One grid step = one tower (post-norm encoder stack + AlignProjector).

    x_ref    : [B*S, E]   flattened, sublane-aligned activations (f32)
    am_ref   : [B*S, B*S] additive mask (0 / -1e9): block-diag batch + key pad
    wqkv_ref : [L, E, 3E] fused Q|K|V projection (bf16, transposed)
    bqkv_ref : [L, 1, 3E] (f32)
    wo_ref   : [L, E, E]  out-projection (bf16, transposed)
    w1_ref   : [L, E, F]  FFN in  (bf16, transposed)
    w2_ref   : [L, F, E]  FFN out (bf16, transposed)
    ep_ref   : [L, 6, E]  rows = [bo, ln1_g, ln1_b, b2, ln2_g, ln2_b] (f32)
    fp_ref   : [L, 1, F]  FFN hidden bias (f32)
    wproj_ref: [E, P]     AlignProjector weight (bf16, transposed, no bias)
    o_ref    : [b_out, P] projected CLS embeddings (sublane/lane dense)
    """
    E = num_heads * head_dim
    BS = batch * seq
    scale = 1.0 / math.sqrt(head_dim)

    x = x_ref[...].astype(jnp.float32)            # [BS, E]
    amask = am_ref[...]                           # [BS, BS]

    def recip(d):
        return pl.reciprocal(d, approx=True) if APPROX_RECIP else 1.0 / d

    for l in range(num_layers):                   # static unroll
        wqkv = wqkv_ref[l]                        # [E, 3E] bf16
        bqkv = bqkv_ref[l]                        # [1, 3E] f32
        wo = wo_ref[l]                            # [E, E]  bf16
        w1 = w1_ref[l]                            # [E, F]  bf16
        w2 = w2_ref[l]                            # [F, E]  bf16
        ep = ep_ref[l]                            # [6, E]  f32
        b1 = fp_ref[l]                            # [1, F]  f32

        # Fused QKV projection: one [BS, E] x [E, 3E] bf16 MXU push.
        qkv = jnp.dot(x.astype(jnp.bfloat16), wqkv,
                      preferred_element_type=jnp.float32) + bqkv
        q = qkv[:, 0 * E:1 * E]
        k = qkv[:, 1 * E:2 * E]
        v = qkv[:, 2 * E:3 * E]

        # Multi-head attention over the FLATTENED batch; cross-batch and
        # padded keys are killed by the additive block mask (free VPU add).
        heads = []
        for h in range(num_heads):
            c0 = h * head_dim
            qh = q[:, c0:c0 + head_dim].astype(jnp.bfloat16)
            kh = k[:, c0:c0 + head_dim].astype(jnp.bfloat16)
            vh = v[:, c0:c0 + head_dim].astype(jnp.bfloat16)
            s = lax.dot_general(qh, kh, (((1,), (1,)), ((), ())),
                                preferred_element_type=jnp.float32) * scale
            s = s + amask
            s = s - jnp.max(s, axis=-1, keepdims=True)
            p = jnp.exp(s)
            p = p * recip(jnp.sum(p, axis=-1, keepdims=True))
            heads.append(jnp.dot(p.astype(jnp.bfloat16), vh,
                                 preferred_element_type=jnp.float32))
        attn = jnp.concatenate(heads, axis=-1)                     # [BS, E]

        # Single full-depth out-projection (K = E).
        attn = jnp.dot(attn.astype(jnp.bfloat16), wo,
                       preferred_element_type=jnp.float32) + ep[0:1, :]

        # residual + LayerNorm1 (post-norm, PyTorch default) — f32 reductions
        y = x + attn
        mu = jnp.mean(y, axis=-1, keepdims=True)
        var = jnp.mean((y - mu) ** 2, axis=-1, keepdims=True)
        y = (y - mu) * lax.rsqrt(var + 1e-5) * ep[1:2, :] + ep[2:3, :]

        # FFN (ReLU) + residual + LayerNorm2
        hdn = jnp.maximum(
            jnp.dot(y.astype(jnp.bfloat16), w1,
                    preferred_element_type=jnp.float32) + b1, 0.0)
        ff = jnp.dot(hdn.astype(jnp.bfloat16), w2,
                     preferred_element_type=jnp.float32) + ep[3:4, :]
        z = y + ff
        mu = jnp.mean(z, axis=-1, keepdims=True)
        var = jnp.mean((z - mu) ** 2, axis=-1, keepdims=True)
        x = (z - mu) * lax.rsqrt(var + 1e-5) * ep[4:5, :] + ep[5:6, :]

    # CLS gather via one-hot matmul: row b selects x[b*seq]; rows >= batch
    # select nothing (zeros) so the output slab is sublane-dense with no
    # per-batch slices or concats.
    col = lax.broadcasted_iota(jnp.int32, (b_out, BS), 1)
    tgt = lax.broadcasted_iota(jnp.int32, (b_out, BS), 0) * seq
    sel = (col == tgt).astype(jnp.float32)
    cls = jnp.dot(sel, x, preferred_element_type=jnp.float32)      # [b_out, E]

    # AlignProjector: L2 norm -> Linear(no bias) -> L2 norm (eps keeps the
    # zero padding rows finite).
    cls = cls * lax.rsqrt(jnp.sum(cls * cls, axis=-1, keepdims=True) + 1e-12)
    proj = jnp.dot(cls.astype(jnp.bfloat16), wproj_ref[...],
                   preferred_element_type=jnp.float32)              # [b_out, P]
    proj = proj * lax.rsqrt(jnp.sum(proj * proj, axis=-1, keepdims=True) + 1e-12)
    o_ref[...] = proj


def _tower_spec(shape):
    """BlockSpec selecting one tower (leading dim squeezed) per grid step."""
    rest = tuple(shape[1:])
    zeros = (0,) * len(rest)
    return pl.BlockSpec((None,) + rest, lambda t, _z=zeros: (t,) + _z)


def towers_forward(x_stack, am_stack, tw, num_heads, batch):
    """Both towers in ONE pallas_call.  x_stack: [2, B*S_pad, E]."""
    n_towers, BS, E = x_stack.shape
    L = tw["wqkv_t"].shape[1]
    P = tw["wproj_t"].shape[2]
    seq = BS // batch
    b_out = ((batch + 7) // 8) * 8                 # sublane-dense output rows
    kern = functools.partial(_towers_kernel, L, num_heads, E // num_heads,
                             batch, seq, b_out)
    in_specs = [
        _tower_spec(x_stack.shape),        # activations
        _tower_spec(am_stack.shape),       # additive attention mask
        _tower_spec(tw["wqkv_t"].shape),   # fused QKV weight (bf16)
        _tower_spec(tw["bqkv"].shape),     # fused QKV bias
        _tower_spec(tw["wo_t"].shape),     # Wo^T (bf16)
        _tower_spec(tw["w1_t"].shape),     # W1^T (bf16)
        _tower_spec(tw["w2_t"].shape),     # W2^T (bf16)
        _tower_spec(tw["eparams"].shape),  # packed bo / LN1 / b2 / LN2 params
        _tower_spec(tw["fparams"].shape),  # FFN hidden bias
        _tower_spec(tw["wproj_t"].shape),  # AlignProjector weight (bf16)
    ]
    return pl.pallas_call(
        kern,
        grid=(n_towers,),
        in_specs=in_specs,
        out_specs=_tower_spec((n_towers, b_out, P)),
        out_shape=jax.ShapeDtypeStruct((n_towers, b_out, P), jnp.float32),
        compiler_params=pltpu.CompilerParams(
            dimension_semantics=("parallel",)),    # tower axis -> 2 TCs on v7x
    )(x_stack, am_stack, tw["wqkv_t"], tw["bqkv"], tw["wo_t"], tw["w1_t"],
      tw["w2_t"], tw["eparams"], tw["fparams"], tw["wproj_t"])


# ----------------------------- plain-JAX glue -------------------------------
def time_handler_mod(x, t, mask, params, cfg):
    """ATAT-style time-film tokenizer.  x, t, mask: [B, T, num_bands]."""
    B, T, nb = x.shape
    M, Tmax = cfg["num_harmonics"], cfg["Tmax"]
    n = jnp.arange(1, M + 1, dtype=jnp.float32)
    outs, masks, ts = [], [], []
    for band in range(nb):
        tb = t[:, :, band]
        xb = x[:, :, band:band + 1]
        ang = 2.0 * jnp.pi * tb[:, :, None] * n[None, None, :] / Tmax
        harm = jnp.concatenate([jnp.sin(ang), jnp.cos(ang)], axis=-1)   # [B,T,2M]
        alpha = harm @ params["Wa"][band]
        beta = harm @ params["Wb"][band]
        feat = xb @ params["Wx"][band]
        outs.append(alpha * feat + beta)
        masks.append(mask[:, :, band:band + 1])
        ts.append(tb[:, :, None])
    return (jnp.concatenate(outs, axis=1),
            jnp.concatenate(masks, axis=1),
            jnp.concatenate(ts, axis=1))


def tabular_embedding(f, params):
    """Per-feature affine tokenizer: [B, F] -> [B, F, E]."""
    return f[:, :, None] * params["W_tok"][None, :, :] + params["b_tok"][None, :, :]


def build_attn_mask(key_valid, batch, s_pad):
    """Additive [B*S, B*S] mask: 0 inside own batch block on valid keys, -1e9 else."""
    bs = batch * s_pad
    bid = jnp.repeat(jnp.arange(batch, dtype=jnp.int32), s_pad)
    same = bid[:, None] == bid[None, :]
    kv = key_valid.reshape(bs) > 0.5
    ok = jnp.logical_and(same, kv[None, :])
    return jnp.where(ok, 0.0, -1e9).astype(jnp.float32)


def _catat_forward(params, data, time, tabular_feat, mask):
    B = data.shape[0]
    E = LC_CFG["embedding_size"]

    # ---- light-curve tokenizer + CLS token ----
    x_mod, m_mod, _ = time_handler_mod(data, time, mask, params["lc_time"], LC_CFG)
    tok = jnp.broadcast_to(params["lc_token"], (B, 1, E))
    x_seq = jnp.concatenate([tok, x_mod], axis=1)                     # [B, S_lc, E]
    x_valid = jnp.concatenate([jnp.ones((B, 1), jnp.float32),
                               m_mod[..., 0].astype(jnp.float32)], axis=1)

    # ---- tabular tokenizer + CLS token ----
    f_mod = tabular_embedding(tabular_feat, params["ft_embed"])
    tokf = jnp.broadcast_to(params["ft_token"], (B, 1, E))
    f_seq = jnp.concatenate([tokf, f_mod], axis=1)                    # [B, S_ft, E]
    f_valid = jnp.ones((B, f_seq.shape[1]), jnp.float32)              # mask=None

    # ---- pad to a common sublane-aligned length, flatten, stack towers ----
    s_pad = ((max(x_seq.shape[1], f_seq.shape[1]) + 7) // 8) * 8

    def prep(seq, valid):
        S = seq.shape[1]
        seq = jnp.pad(seq, ((0, 0), (0, s_pad - S), (0, 0)))
        valid = jnp.pad(valid, ((0, 0), (0, s_pad - S)))
        return seq.reshape(B * s_pad, E).astype(jnp.float32), valid

    x2d, xv = prep(x_seq, x_valid)
    f2d, fv = prep(f_seq, f_valid)
    x_stack = jnp.stack([x2d, f2d], axis=0)                           # [2, B*S, E]
    am_stack = jnp.stack([build_attn_mask(xv, B, s_pad),
                          build_attn_mask(fv, B, s_pad)], axis=0)     # [2, B*S, B*S]

    out = towers_forward(x_stack, am_stack, params["towers"],
                         LC_CFG["num_heads"], B)                      # [2, 8, P]
    return out[0, :B, :], out[1, :B, :]


_catat_forward_jit = jax.jit(_catat_forward)


def catat_forward(params, data=None, data_err=None, time=None,
                  tabular_feat=None, mask=None):
    if GENERAL["use_lightcurves"] and GENERAL["use_lightcurves_err"]:
        # TODO(synk): stacked (data, data_err) tokenizer path not given in spec.
        data = jnp.stack((data, data_err), axis=data.ndim - 1)
    return _catat_forward_jit(params, data, time, tabular_feat, mask)


# --------------------------- deterministic params ---------------------------
def _xavier(key, out_d, in_d):
    std = math.sqrt(2.0 / (in_d + out_d))
    return jax.random.normal(key, (out_d, in_d), jnp.float32) * std


def make_tower_params(key, E, F, L, P):
    """Packed weights for an L-layer post-norm encoder + AlignProjector."""
    kl = jax.random.split(key, L + 1)
    wqkv, bqkv, wo, w1, w2, ep, fp = [], [], [], [], [], [], []
    for lk in kl[:L]:
        ks = jax.random.split(lk, 6)
        wqkv.append(jnp.concatenate([_xavier(ks[0], E, E).T,
                                     _xavier(ks[1], E, E).T,
                                     _xavier(ks[2], E, E).T], axis=1))   # [E, 3E]
        bqkv.append(jnp.zeros((1, 3 * E), jnp.float32))
        wo.append(_xavier(ks[3], E, E).T)
        w1.append(_xavier(ks[4], F, E).T)
        w2.append(_xavier(ks[5], E, F).T)
        ep.append(jnp.stack([jnp.zeros((E,), jnp.float32),   # bo
                             jnp.ones((E,), jnp.float32),    # ln1 gamma
                             jnp.zeros((E,), jnp.float32),   # ln1 beta
                             jnp.zeros((E,), jnp.float32),   # FFN out bias
                             jnp.ones((E,), jnp.float32),    # ln2 gamma
                             jnp.zeros((E,), jnp.float32)])) # ln2 beta
        fp.append(jnp.zeros((1, F), jnp.float32))            # FFN hidden bias
    return dict(
        wqkv_t=jnp.stack(wqkv).astype(jnp.bfloat16),
        bqkv=jnp.stack(bqkv),
        wo_t=jnp.stack(wo).astype(jnp.bfloat16),
        w1_t=jnp.stack(w1).astype(jnp.bfloat16),
        w2_t=jnp.stack(w2).astype(jnp.bfloat16),
        eparams=jnp.stack(ep),
        fparams=jnp.stack(fp),
        wproj_t=_xavier(kl[L], P, E).T.astype(jnp.bfloat16),
    )


def make_params(key):
    E = LC_CFG["embedding_size"]
    assert E == FT_CFG["embedding_size"]
    assert LC_CFG["num_heads"] == FT_CFG["num_heads"]
    assert LC_CFG["ffn_size"] == FT_CFG["ffn_size"]
    assert LC_CFG["num_layers"] == FT_CFG["num_layers"]
    nb, M = LC_CFG["num_bands"], LC_CFG["num_harmonics"]
    keys = jax.random.split(key, 6)
    tk = jax.random.split(keys[0], 3 * nb)
    lc_time = dict(
        Wa=jnp.stack([_xavier(tk[3 * b + 0], E, 2 * M).T for b in range(nb)]),
        Wb=jnp.stack([_xavier(tk[3 * b + 1], E, 2 * M).T for b in range(nb)]),
        Wx=jnp.stack([_xavier(tk[3 * b + 2], E, 1).T for b in range(nb)]),
    )
    lc_tw = make_tower_params(keys[1], E, LC_CFG["ffn_size"],
                              LC_CFG["num_layers"], PROJ_DIM)
    ft_tw = make_tower_params(keys[4], E, FT_CFG["ffn_size"],
                              FT_CFG["num_layers"], PROJ_DIM)
    towers = jax.tree_util.tree_map(lambda a, b: jnp.stack([a, b], axis=0),
                                    lc_tw, ft_tw)                    # [2, ...]
    lc_token = jax.random.normal(keys[2], (1, 1, E), jnp.float32) * 0.02
    Fd = FT_CFG["num_features"]
    ft_embed = dict(
        W_tok=jax.random.normal(keys[3], (Fd, E), jnp.float32)
        * math.sqrt(2.0 / (1 + E)),
        b_tok=jnp.zeros((Fd, E), jnp.float32),
    )
    ft_token = jax.random.normal(keys[5], (1, 1, E), jnp.float32) * 0.02
    return dict(
        lc_time=lc_time, towers=towers, lc_token=lc_token,
        ft_embed=ft_embed, ft_token=ft_token,
        logit_scale=jnp.array(math.log(1.0 / 0.07), jnp.float32),  # unused in fwd
    )


# ---------------------------------- main -------------------------------------
if __name__ == "__main__":
    key = jax.random.PRNGKey(0)
    k_param, k_data = jax.random.split(key)
    params = make_params(k_param)

    B, T, nb = 2, LC_CFG["seq_len"], LC_CFG["num_bands"]
    Fd = FT_CFG["num_features"]
    kd = jax.random.split(k_data, 4)
    data = jax.random.normal(kd[0], (B, T, nb), jnp.float32)
    time_arr = jnp.cumsum(
        jax.random.uniform(kd[1], (B, T, nb), minval=0.5, maxval=30.0), axis=1)
    mask = (jax.random.uniform(kd[2], (B, T, nb)) > 0.2).astype(jnp.float32)
    mask = mask.at[:, 0, :].set(1.0)  # keep at least one valid observation per band
    tabular = jax.random.normal(kd[3], (B, Fd), jnp.float32)

    x_proj, f_proj = catat_forward(params, data=data, time=time_arr,
                                   tabular_feat=tabular, mask=mask)
    jax.block_until_ready((x_proj, f_proj))
    assert x_proj.shape == (B, PROJ_DIM) and f_proj.shape == (B, PROJ_DIM)
    assert bool(jnp.all(jnp.isfinite(x_proj))) and bool(jnp.all(jnp.isfinite(f_proj)))
    print("KERNEL_OK")
</pallas_src>

<mosaic_0001>
module attributes {stable_mosaic.version = 11 : i64} {
  func.func @_towers_kernel(%arg0: i32, %arg1: memref<1x48x32xf32, #tpu.memory_space<vmem>>, %arg2: memref<1x48x48xf32, #tpu.memory_space<vmem>>, %arg3: memref<1x1x32x96xbf16, #tpu.memory_space<vmem>>, %arg4: memref<1x1x1x96xf32, #tpu.memory_space<vmem>>, %arg5: memref<1x1x32x32xbf16, #tpu.memory_space<vmem>>, %arg6: memref<1x1x32x64xbf16, #tpu.memory_space<vmem>>, %arg7: memref<1x1x64x32xbf16, #tpu.memory_space<vmem>>, %arg8: memref<1x1x6x32xf32, #tpu.memory_space<vmem>>, %arg9: memref<1x1x1x64xf32, #tpu.memory_space<vmem>>, %arg10: memref<1x32x128xbf16, #tpu.memory_space<vmem>>, %arg11: memref<1x8x128xf32, #tpu.memory_space<vmem>>) attributes {dimension_semantics = [#tpu.dimension_semantics<parallel>], iteration_bounds = array<i64: 2>, scalar_prefetch = 0 : i64, scratch_operands = 0 : i64, tpu.core_type = #tpu.core_type<tc>, window_params = [{transform_indices = @transform_0, window_bounds = array<i64: 1, 48, 32>}, {transform_indices = @transform_1, window_bounds = array<i64: 1, 48, 48>}, {transform_indices = @transform_2, window_bounds = array<i64: 1, 1, 32, 96>}, {transform_indices = @transform_3, window_bounds = array<i64: 1, 1, 1, 96>}, {transform_indices = @transform_4, window_bounds = array<i64: 1, 1, 32, 32>}, {transform_indices = @transform_5, window_bounds = array<i64: 1, 1, 32, 64>}, {transform_indices = @transform_6, window_bounds = array<i64: 1, 1, 64, 32>}, {transform_indices = @transform_7, window_bounds = array<i64: 1, 1, 6, 32>}, {transform_indices = @transform_8, window_bounds = array<i64: 1, 1, 1, 64>}, {transform_indices = @transform_9, window_bounds = array<i64: 1, 32, 128>}, {transform_indices = @transform_10, window_bounds = array<i64: 1, 8, 128>}]} {
    %c0 = arith.constant 0 : index
    %c0_0 = arith.constant 0 : index
    %c0_1 = arith.constant 0 : index
    %0 = vector.load %arg1[%c0, %c0_0, %c0_1] : memref<1x48x32xf32, #tpu.memory_space<vmem>>, vector<1x48x32xf32>
    %1 = vector.shape_cast %0 : vector<1x48x32xf32> to vector<48x32xf32>
    %c0_2 = arith.constant 0 : index
    %c0_3 = arith.constant 0 : index
    %c0_4 = arith.constant 0 : index
    %2 = vector.load %arg2[%c0_2, %c0_3, %c0_4] : memref<1x48x48xf32, #tpu.memory_space<vmem>>, vector<1x48x48xf32>
    %3 = vector.shape_cast %2 : vector<1x48x48xf32> to vector<48x48xf32>
    %c0_5 = arith.constant 0 : index
    %c0_6 = arith.constant 0 : index
    %c0_7 = arith.constant 0 : index
    %c0_8 = arith.constant 0 : index
    %4 = vector.load %arg3[%c0_5, %c0_6, %c0_7, %c0_8] : memref<1x1x32x96xbf16, #tpu.memory_space<vmem>>, vector<1x1x32x96xbf16>
    %5 = vector.shape_cast %4 : vector<1x1x32x96xbf16> to vector<32x96xbf16>
    %c0_9 = arith.constant 0 : index
    %c0_10 = arith.constant 0 : index
    %c0_11 = arith.constant 0 : index
    %c0_12 = arith.constant 0 : index
    %6 = vector.load %arg4[%c0_9, %c0_10, %c0_11, %c0_12] : memref<1x1x1x96xf32, #tpu.memory_space<vmem>>, vector<1x1x1x96xf32>
    %7 = vector.shape_cast %6 : vector<1x1x1x96xf32> to vector<1x96xf32>
    %c0_13 = arith.constant 0 : index
    %c0_14 = arith.constant 0 : index
    %c0_15 = arith.constant 0 : index
    %c0_16 = arith.constant 0 : index
    %8 = vector.load %arg5[%c0_13, %c0_14, %c0_15, %c0_16] : memref<1x1x32x32xbf16, #tpu.memory_space<vmem>>, vector<1x1x32x32xbf16>
    %9 = vector.shape_cast %8 : vector<1x1x32x32xbf16> to vector<32x32xbf16>
    %c0_17 = arith.constant 0 : index
    %c0_18 = arith.constant 0 : index
    %c0_19 = arith.constant 0 : index
    %c0_20 = arith.constant 0 : index
    %10 = vector.load %arg6[%c0_17, %c0_18, %c0_19, %c0_20] : memref<1x1x32x64xbf16, #tpu.memory_space<vmem>>, vector<1x1x32x64xbf16>
    %11 = vector.shape_cast %10 : vector<1x1x32x64xbf16> to vector<32x64xbf16>
    %c0_21 = arith.constant 0 : index
    %c0_22 = arith.constant 0 : index
    %c0_23 = arith.constant 0 : index
    %c0_24 = arith.constant 0 : index
    %12 = vector.load %arg7[%c0_21, %c0_22, %c0_23, %c0_24] : memref<1x1x64x32xbf16, #tpu.memory_space<vmem>>, vector<1x1x64x32xbf16>
    %13 = vector.shape_cast %12 : vector<1x1x64x32xbf16> to vector<64x32xbf16>
    %c0_25 = arith.constant 0 : index
    %c0_26 = arith.constant 0 : index
    %c0_27 = arith.constant 0 : index
    %c0_28 = arith.constant 0 : index
    %14 = vector.load %arg8[%c0_25, %c0_26, %c0_27, %c0_28] : memref<1x1x6x32xf32, #tpu.memory_space<vmem>>, vector<1x1x6x32xf32>
    %15 = vector.shape_cast %14 : vector<1x1x6x32xf32> to vector<6x32xf32>
    %c0_29 = arith.constant 0 : index
    %c0_30 = arith.constant 0 : index
    %c0_31 = arith.constant 0 : index
    %c0_32 = arith.constant 0 : index
    %16 = vector.load %arg9[%c0_29, %c0_30, %c0_31, %c0_32] : memref<1x1x1x64xf32, #tpu.memory_space<vmem>>, vector<1x1x1x64xf32>
    %17 = vector.shape_cast %16 : vector<1x1x1x64xf32> to vector<1x64xf32>
    %18 = arith.truncf %1 : vector<48x32xf32> to vector<48x32xbf16>
    %cst = arith.constant dense<0.000000e+00> : vector<48x96xf32>
    %19 = tpu.matmul %18, %5, %cst {dimension_numbers = #tpu.dot_dimension_numbers<[1], [0], [0], [1], [0, 0, 1, 1], [], []>} : vector<48x32xbf16>, vector<32x96xbf16>, vector<48x96xf32> -> vector<48x96xf32>
    %20 = vector.broadcast %7 : vector<1x96xf32> to vector<48x96xf32>
    %21 = arith.addf %19, %20 : vector<48x96xf32>
    %22 = vector.extract_strided_slice %21 {offsets = [0, 0], sizes = [48, 32], strides = [1, 1]} : vector<48x96xf32> to vector<48x32xf32>
    %23 = vector.extract_strided_slice %21 {offsets = [0, 32], sizes = [48, 32], strides = [1, 1]} : vector<48x96xf32> to vector<48x32xf32>
    %24 = vector.extract_strided_slice %21 {offsets = [0, 64], sizes = [48, 32], strides = [1, 1]} : vector<48x96xf32> to vector<48x32xf32>
    %25 = vector.extract_strided_slice %22 {offsets = [0, 0], sizes = [48, 8], strides = [1, 1]} : vector<48x32xf32> to vector<48x8xf32>
    %26 = arith.truncf %25 : vector<48x8xf32> to vector<48x8xbf16>
    %27 = vector.extract_strided_slice %23 {offsets = [0, 0], sizes = [48, 8], strides = [1, 1]} : vector<48x32xf32> to vector<48x8xf32>
    %28 = arith.truncf %27 : vector<48x8xf32> to vector<48x8xbf16>
    %29 = vector.extract_strided_slice %24 {offsets = [0, 0], sizes = [48, 8], strides = [1, 1]} : vector<48x32xf32> to vector<48x8xf32>
    %30 = arith.truncf %29 : vector<48x8xf32> to vector<48x8xbf16>
    %cst_33 = arith.constant dense<0.000000e+00> : vector<48x48xf32>
    %31 = tpu.matmul %26, %28, %cst_33 {dimension_numbers = #tpu.dot_dimension_numbers<[1], [1], [0], [0], [0, 0, 1, 0], [], []>} : vector<48x8xbf16>, vector<48x8xbf16>, vector<48x48xf32> -> vector<48x48xf32>
    %cst_34 = arith.constant 0.353553385 : f32
    %32 = vector.broadcast %cst_34 : f32 to vector<48x48xf32>
    %33 = arith.mulf %31, %32 : vector<48x48xf32>
    %34 = arith.addf %33, %3 : vector<48x48xf32>
    %cst_35 = arith.constant dense<0xFF800000> : vector<48xf32>
    %35 = vector.multi_reduction <maximumf>, %34, %cst_35 [1] : vector<48x48xf32> to vector<48xf32>
    %36 = vector.shape_cast %35 : vector<48xf32> to vector<48x1xf32>
    %37 = vector.broadcast %36 : vector<48x1xf32> to vector<48x48xf32>
    %38 = arith.subf %34, %37 : vector<48x48xf32>
    %39 = math.exp %38 : vector<48x48xf32>
    %cst_36 = arith.constant dense<0.000000e+00> : vector<48xf32>
    %40 = vector.multi_reduction <add>, %39, %cst_36 [1] : vector<48x48xf32> to vector<48xf32>
    %41 = vector.shape_cast %40 : vector<48xf32> to vector<48x1xf32>
    %42 = tpu.reciprocal %41 {approx = true} : vector<48x1xf32> -> vector<48x1xf32>
    %43 = vector.broadcast %42 : vector<48x1xf32> to vector<48x48xf32>
    %44 = arith.mulf %39, %43 : vector<48x48xf32>
    %45 = arith.truncf %44 : vector<48x48xf32> to vector<48x48xbf16>
    %cst_37 = arith.constant dense<0.000000e+00> : vector<48x8xf32>
    %46 = tpu.matmul %45, %30, %cst_37 {dimension_numbers = #tpu.dot_dimension_numbers<[1], [0], [0], [1], [0, 0, 1, 1], [], []>} : vector<48x48xbf16>, vector<48x8xbf16>, vector<48x8xf32> -> vector<48x8xf32>
    %47 = vector.extract_strided_slice %22 {offsets = [0, 8], sizes = [48, 8], strides = [1, 1]} : vector<48x32xf32> to vector<48x8xf32>
    %48 = arith.truncf %47 : vector<48x8xf32> to vector<48x8xbf16>
    %49 = vector.extract_strided_slice %23 {offsets = [0, 8], sizes = [48, 8], strides = [1, 1]} : vector<48x32xf32> to vector<48x8xf32>
    %50 = arith.truncf %49 : vector<48x8xf32> to vector<48x8xbf16>
    %51 = vector.extract_strided_slice %24 {offsets = [0, 8], sizes = [48, 8], strides = [1, 1]} : vector<48x32xf32> to vector<48x8xf32>
    %52 = arith.truncf %51 : vector<48x8xf32> to vector<48x8xbf16>
    %cst_38 = arith.constant dense<0.000000e+00> : vector<48x48xf32>
    %53 = tpu.matmul %48, %50, %cst_38 {dimension_numbers = #tpu.dot_dimension_numbers<[1], [1], [0], [0], [0, 0, 1, 0], [], []>} : vector<48x8xbf16>, vector<48x8xbf16>, vector<48x48xf32> -> vector<48x48xf32>
    %cst_39 = arith.constant 0.353553385 : f32
    %54 = vector.broadcast %cst_39 : f32 to vector<48x48xf32>
    %55 = arith.mulf %53, %54 : vector<48x48xf32>
    %56 = arith.addf %55, %3 : vector<48x48xf32>
    %cst_40 = arith.constant dense<0xFF800000> : vector<48xf32>
    %57 = vector.multi_reduction <maximumf>, %56, %cst_40 [1] : vector<48x48xf32> to vector<48xf32>
    %58 = vector.shape_cast %57 : vector<48xf32> to vector<48x1xf32>
    %59 = vector.broadcast %58 : vector<48x1xf32> to vector<48x48xf32>
    %60 = arith.subf %56, %59 : vector<48x48xf32>
    %61 = math.exp %60 : vector<48x48xf32>
    %cst_41 = arith.constant dense<0.000000e+00> : vector<48xf32>
    %62 = vector.multi_reduction <add>, %61, %cst_41 [1] : vector<48x48xf32> to vector<48xf32>
    %63 = vector.shape_cast %62 : vector<48xf32> to vector<48x1xf32>
    %64 = tpu.reciprocal %63 {approx = true} : vector<48x1xf32> -> vector<48x1xf32>
    %65 = vector.broadcast %64 : vector<48x1xf32> to vector<48x48xf32>
    %66 = arith.mulf %61, %65 : vector<48x48xf32>
    %67 = arith.truncf %66 : vector<48x48xf32> to vector<48x48xbf16>
    %cst_42 = arith.constant dense<0.000000e+00> : vector<48x8xf32>
    %68 = tpu.matmul %67, %52, %cst_42 {dimension_numbers = #tpu.dot_dimension_numbers<[1], [0], [0], [1], [0, 0, 1, 1], [], []>} : vector<48x48xbf16>, vector<48x8xbf16>, vector<48x8xf32> -> vector<48x8xf32>
    %69 = vector.extract_strided_slice %22 {offsets = [0, 16], sizes = [48, 8], strides = [1, 1]} : vector<48x32xf32> to vector<48x8xf32>
    %70 = arith.truncf %69 : vector<48x8xf32> to vector<48x8xbf16>
    %71 = vector.extract_strided_slice %23 {offsets = [0, 16], sizes = [48, 8], strides = [1, 1]} : vector<48x32xf32> to vector<48x8xf32>
    %72 = arith.truncf %71 : vector<48x8xf32> to vector<48x8xbf16>
    %73 = vector.extract_strided_slice %24 {offsets = [0, 16], sizes = [48, 8], strides = [1, 1]} : vector<48x32xf32> to vector<48x8xf32>
    %74 = arith.truncf %73 : vector<48x8xf32> to vector<48x8xbf16>
    %cst_43 = arith.constant dense<0.000000e+00> : vector<48x48xf32>
    %75 = tpu.matmul %70, %72, %cst_43 {dimension_numbers = #tpu.dot_dimension_numbers<[1], [1], [0], [0], [0, 0, 1, 0], [], []>} : vector<48x8xbf16>, vector<48x8xbf16>, vector<48x48xf32> -> vector<48x48xf32>
    %cst_44 = arith.constant 0.353553385 : f32
    %76 = vector.broadcast %cst_44 : f32 to vector<48x48xf32>
    %77 = arith.mulf %75, %76 : vector<48x48xf32>
    %78 = arith.addf %77, %3 : vector<48x48xf32>
    %cst_45 = arith.constant dense<0xFF800000> : vector<48xf32>
    %79 = vector.multi_reduction <maximumf>, %78, %cst_45 [1] : vector<48x48xf32> to vector<48xf32>
    %80 = vector.shape_cast %79 : vector<48xf32> to vector<48x1xf32>
    %81 = vector.broadcast %80 : vector<48x1xf32> to vector<48x48xf32>
    %82 = arith.subf %78, %81 : vector<48x48xf32>
    %83 = math.exp %82 : vector<48x48xf32>
    %cst_46 = arith.constant dense<0.000000e+00> : vector<48xf32>
    %84 = vector.multi_reduction <add>, %83, %cst_46 [1] : vector<48x48xf32> to vector<48xf32>
    %85 = vector.shape_cast %84 : vector<48xf32> to vector<48x1xf32>
    %86 = tpu.reciprocal %85 {approx = true} : vector<48x1xf32> -> vector<48x1xf32>
    %87 = vector.broadcast %86 : vector<48x1xf32> to vector<48x48xf32>
    %88 = arith.mulf %83, %87 : vector<48x48xf32>
    %89 = arith.truncf %88 : vector<48x48xf32> to vector<48x48xbf16>
    %cst_47 = arith.constant dense<0.000000e+00> : vector<48x8xf32>
    %90 = tpu.matmul %89, %74, %cst_47 {dimension_numbers = #tpu.dot_dimension_numbers<[1], [0], [0], [1], [0, 0, 1, 1], [], []>} : vector<48x48xbf16>, vector<48x8xbf16>, vector<48x8xf32> -> vector<48x8xf32>
    %91 = vector.extract_strided_slice %22 {offsets = [0, 24], sizes = [48, 8], strides = [1, 1]} : vector<48x32xf32> to vector<48x8xf32>
    %92 = arith.truncf %91 : vector<48x8xf32> to vector<48x8xbf16>
    %93 = vector.extract_strided_slice %23 {offsets = [0, 24], sizes = [48, 8], strides = [1, 1]} : vector<48x32xf32> to vector<48x8xf32>
    %94 = arith.truncf %93 : vector<48x8xf32> to vector<48x8xbf16>
    %95 = vector.extract_strided_slice %24 {offsets = [0, 24], sizes = [48, 8], strides = [1, 1]} : vector<48x32xf32> to vector<48x8xf32>
    %96 = arith.truncf %95 : vector<48x8xf32> to vector<48x8xbf16>
    %cst_48 = arith.constant dense<0.000000e+00> : vector<48x48xf32>
    %97 = tpu.matmul %92, %94, %cst_48 {dimension_numbers = #tpu.dot_dimension_numbers<[1], [1], [0], [0], [0, 0, 1, 0], [], []>} : vector<48x8xbf16>, vector<48x8xbf16>, vector<48x48xf32> -> vector<48x48xf32>
    %cst_49 = arith.constant 0.353553385 : f32
    %98 = vector.broadcast %cst_49 : f32 to vector<48x48xf32>
    %99 = arith.mulf %97, %98 : vector<48x48xf32>
    %100 = arith.addf %99, %3 : vector<48x48xf32>
    %cst_50 = arith.constant dense<0xFF800000> : vector<48xf32>
    %101 = vector.multi_reduction <maximumf>, %100, %cst_50 [1] : vector<48x48xf32> to vector<48xf32>
    %102 = vector.shape_cast %101 : vector<48xf32> to vector<48x1xf32>
    %103 = vector.broadcast %102 : vector<48x1xf32> to vector<48x48xf32>
    %104 = arith.subf %100, %103 : vector<48x48xf32>
    %105 = math.exp %104 : vector<48x48xf32>
    %cst_51 = arith.constant dense<0.000000e+00> : vector<48xf32>
    %106 = vector.multi_reduction <add>, %105, %cst_51 [1] : vector<48x48xf32> to vector<48xf32>
    %107 = vector.shape_cast %106 : vector<48xf32> to vector<48x1xf32>
    %108 = tpu.reciprocal %107 {approx = true} : vector<48x1xf32> -> vector<48x1xf32>
    %109 = vector.broadcast %108 : vector<48x1xf32> to vector<48x48xf32>
    %110 = arith.mulf %105, %109 : vector<48x48xf32>
    %111 = arith.truncf %110 : vector<48x48xf32> to vector<48x48xbf16>
    %cst_52 = arith.constant dense<0.000000e+00> : vector<48x8xf32>
    %112 = tpu.matmul %111, %96, %cst_52 {dimension_numbers = #tpu.dot_dimension_numbers<[1], [0], [0], [1], [0, 0, 1, 1], [], []>} : vector<48x48xbf16>, vector<48x8xbf16>, vector<48x8xf32> -> vector<48x8xf32>
    %113 = tpu.concatenate %46, %68, %90, %112 in 1 : vector<48x8xf32>, vector<48x8xf32>, vector<48x8xf32>, vector<48x8xf32> -> vector<48x32xf32>
    %114 = arith.truncf %113 : vector<48x32xf32> to vector<48x32xbf16>
    %cst_53 = arith.constant dense<0.000000e+00> : vector<48x32xf32>
    %115 = tpu.matmul %114, %9, %cst_53 {dimension_numbers = #tpu.dot_dimension_numbers<[1], [0], [0], [1], [0, 0, 1, 1], [], []>} : vector<48x32xbf16>, vector<32x32xbf16>, vector<48x32xf32> -> vector<48x32xf32>
    %116 = vector.extract_strided_slice %15 {offsets = [0, 0], sizes = [1, 32], strides = [1, 1]} : vector<6x32xf32> to vector<1x32xf32>
    %117 = vector.broadcast %116 : vector<1x32xf32> to vector<48x32xf32>
    %118 = arith.addf %115, %117 : vector<48x32xf32>
    %119 = arith.addf %1, %118 : vector<48x32xf32>
    %cst_54 = arith.constant dense<0.000000e+00> : vector<48xf32>
    %120 = vector.multi_reduction <add>, %119, %cst_54 [1] : vector<48x32xf32> to vector<48xf32>
    %121 = vector.shape_cast %120 : vector<48xf32> to vector<48x1xf32>
    %cst_55 = arith.constant 3.200000e+01 : f32
    %122 = vector.broadcast %cst_55 : f32 to vector<48x1xf32>
    %123 = arith.divf %121, %122 : vector<48x1xf32>
    %124 = vector.broadcast %123 : vector<48x1xf32> to vector<48x32xf32>
    %125 = arith.subf %119, %124 : vector<48x32xf32>
    %126 = arith.mulf %125, %125 : vector<48x32xf32>
    %cst_56 = arith.constant dense<0.000000e+00> : vector<48xf32>
    %127 = vector.multi_reduction <add>, %126, %cst_56 [1] : vector<48x32xf32> to vector<48xf32>
    %128 = vector.shape_cast %127 : vector<48xf32> to vector<48x1xf32>
    %cst_57 = arith.constant 3.200000e+01 : f32
    %129 = vector.broadcast %cst_57 : f32 to vector<48x1xf32>
    %130 = arith.divf %128, %129 : vector<48x1xf32>
    %131 = vector.broadcast %123 : vector<48x1xf32> to vector<48x32xf32>
    %132 = arith.subf %119, %131 : vector<48x32xf32>
    %cst_58 = arith.constant 9.99999974E-6 : f32
    %133 = vector.broadcast %cst_58 : f32 to vector<48x1xf32>
    %134 = arith.addf %130, %133 : vector<48x1xf32>
    %135 = math.rsqrt %134 : vector<48x1xf32>
    %136 = vector.broadcast %135 : vector<48x1xf32> to vector<48x32xf32>
    %137 = arith.mulf %132, %136 : vector<48x32xf32>
    %138 = vector.extract_strided_slice %15 {offsets = [1, 0], sizes = [1, 32], strides = [1, 1]} : vector<6x32xf32> to vector<1x32xf32>
    %139 = vector.broadcast %138 : vector<1x32xf32> to vector<48x32xf32>
    %140 = arith.mulf %137, %139 : vector<48x32xf32>
    %141 = vector.extract_strided_slice %15 {offsets = [2, 0], sizes = [1, 32], strides = [1, 1]} : vector<6x32xf32> to vector<1x32xf32>
    %142 = vector.broadcast %141 : vector<1x32xf32> to vector<48x32xf32>
    %143 = arith.addf %140, %142 : vector<48x32xf32>
    %144 = arith.truncf %143 : vector<48x32xf32> to vector<48x32xbf16>
    %cst_59 = arith.constant dense<0.000000e+00> : vector<48x64xf32>
    %145 = tpu.matmul %144, %11, %cst_59 {dimension_numbers = #tpu.dot_dimension_numbers<[1], [0], [0], [1], [0, 0, 1, 1], [], []>} : vector<48x32xbf16>, vector<32x64xbf16>, vector<48x64xf32> -> vector<48x64xf32>
    %146 = vector.broadcast %17 : vector<1x64xf32> to vector<48x64xf32>
    %147 = arith.addf %145, %146 : vector<48x64xf32>
    %cst_60 = arith.constant 0.000000e+00 : f32
    %148 = vector.broadcast %cst_60 : f32 to vector<48x64xf32>
    %149 = arith.maximumf %147, %148 : vector<48x64xf32>
    %150 = arith.truncf %149 : vector<48x64xf32> to vector<48x64xbf16>
    %cst_61 = arith.constant dense<0.000000e+00> : vector<48x32xf32>
    %151 = tpu.matmul %150, %13, %cst_61 {dimension_numbers = #tpu.dot_dimension_numbers<[1], [0], [0], [1], [0, 0, 1, 1], [], []>} : vector<48x64xbf16>, vector<64x32xbf16>, vector<48x32xf32> -> vector<48x32xf32>
    %152 = vector.extract_strided_slice %15 {offsets = [3, 0], sizes = [1, 32], strides = [1, 1]} : vector<6x32xf32> to vector<1x32xf32>
    %153 = vector.broadcast %152 : vector<1x32xf32> to vector<48x32xf32>
    %154 = arith.addf %151, %153 : vector<48x32xf32>
    %155 = arith.addf %143, %154 : vector<48x32xf32>
    %cst_62 = arith.constant dense<0.000000e+00> : vector<48xf32>
    %156 = vector.multi_reduction <add>, %155, %cst_62 [1] : vector<48x32xf32> to vector<48xf32>
    %157 = vector.shape_cast %156 : vector<48xf32> to vector<48x1xf32>
    %cst_63 = arith.constant 3.200000e+01 : f32
    %158 = vector.broadcast %cst_63 : f32 to vector<48x1xf32>
    %159 = arith.divf %157, %158 : vector<48x1xf32>
    %160 = vector.broadcast %159 : vector<48x1xf32> to vector<48x32xf32>
    %161 = arith.subf %155, %160 : vector<48x32xf32>
    %162 = arith.mulf %161, %161 : vector<48x32xf32>
    %cst_64 = arith.constant dense<0.000000e+00> : vector<48xf32>
    %163 = vector.multi_reduction <add>, %162, %cst_64 [1] : vector<48x32xf32> to vector<48xf32>
    %164 = vector.shape_cast %163 : vector<48xf32> to vector<48x1xf32>
    %cst_65 = arith.constant 3.200000e+01 : f32
    %165 = vector.broadcast %cst_65 : f32 to vector<48x1xf32>
    %166 = arith.divf %164, %165 : vector<48x1xf32>
    %167 = vector.broadcast %159 : vector<48x1xf32> to vector<48x32xf32>
    %168 = arith.subf %155, %167 : vector<48x32xf32>
    %cst_66 = arith.constant 9.99999974E-6 : f32
    %169 = vector.broadcast %cst_66 : f32 to vector<48x1xf32>
    %170 = arith.addf %166, %169 : vector<48x1xf32>
    %171 = math.rsqrt %170 : vector<48x1xf32>
    %172 = vector.broadcast %171 : vector<48x1xf32> to vector<48x32xf32>
    %173 = arith.mulf %168, %172 : vector<48x32xf32>
    %174 = vector.extract_strided_slice %15 {offsets = [4, 0], sizes = [1, 32], strides = [1, 1]} : vector<6x32xf32> to vector<1x32xf32>
    %175 = vector.broadcast %174 : vector<1x32xf32> to vector<48x32xf32>
    %176 = arith.mulf %173, %175 : vector<48x32xf32>
    %177 = vector.extract_strided_slice %15 {offsets = [5, 0], sizes = [1, 32], strides = [1, 1]} : vector<6x32xf32> to vector<1x32xf32>
    %178 = vector.broadcast %177 : vector<1x32xf32> to vector<48x32xf32>
    %179 = arith.addf %176, %178 : vector<48x32xf32>
    %180 = tpu.iota {dimensions = array<i32: 1>} : vector<8x48xi32>
    %181 = tpu.iota {dimensions = array<i32: 0>} : vector<8x48xi32>
    %c24_i32 = arith.constant 24 : i32
    %182 = vector.broadcast %c24_i32 : i32 to vector<8x48xi32>
    %183 = arith.muli %181, %182 : vector<8x48xi32>
    %184 = arith.cmpi eq, %180, %183 : vector<8x48xi32>
    %185 = arith.extui %184 : vector<8x48xi1> to vector<8x48xi32>
    %186 = arith.sitofp %185 : vector<8x48xi32> to vector<8x48xf32>
    %cst_67 = arith.constant dense<0.000000e+00> : vector<8x32xf32>
    %187 = tpu.matmul %186, %179, %cst_67 {dimension_numbers = #tpu.dot_dimension_numbers<[1], [0], [0], [1], [0, 0, 1, 1], [], []>} : vector<8x48xf32>, vector<48x32xf32>, vector<8x32xf32> -> vector<8x32xf32>
    %188 = arith.mulf %187, %187 : vector<8x32xf32>
    %cst_68 = arith.constant dense<0.000000e+00> : vector<8xf32>
    %189 = vector.multi_reduction <add>, %188, %cst_68 [1] : vector<8x32xf32> to vector<8xf32>
    %190 = vector.shape_cast %189 : vector<8xf32> to vector<8x1xf32>
    %cst_69 = arith.constant 9.99999996E-13 : f32
    %191 = vector.broadcast %cst_69 : f32 to vector<8x1xf32>
    %192 = arith.addf %190, %191 : vector<8x1xf32>
    %193 = math.rsqrt %192 : vector<8x1xf32>
    %194 = vector.broadcast %193 : vector<8x1xf32> to vector<8x32xf32>
    %195 = arith.mulf %187, %194 : vector<8x32xf32>
    %196 = arith.truncf %195 : vector<8x32xf32> to vector<8x32xbf16>
    %c0_70 = arith.constant 0 : index
    %c0_71 = arith.constant 0 : index
    %c0_72 = arith.constant 0 : index
    %197 = vector.load %arg10[%c0_70, %c0_71, %c0_72] : memref<1x32x128xbf16, #tpu.memory_space<vmem>>, vector<1x32x128xbf16>
    %198 = vector.shape_cast %197 : vector<1x32x128xbf16> to vector<32x128xbf16>
    %cst_73 = arith.constant dense<0.000000e+00> : vector<8x128xf32>
    %199 = tpu.matmul %196, %198, %cst_73 {dimension_numbers = #tpu.dot_dimension_numbers<[1], [0], [0], [1], [0, 0, 1, 1], [], []>} : vector<8x32xbf16>, vector<32x128xbf16>, vector<8x128xf32> -> vector<8x128xf32>
    %200 = arith.mulf %199, %199 : vector<8x128xf32>
    %cst_74 = arith.constant dense<0.000000e+00> : vector<8xf32>
    %201 = vector.multi_reduction <add>, %200, %cst_74 [1] : vector<8x128xf32> to vector<8xf32>
    %202 = vector.shape_cast %201 : vector<8xf32> to vector<8x1xf32>
    %cst_75 = arith.constant 9.99999996E-13 : f32
    %203 = vector.broadcast %cst_75 : f32 to vector<8x1xf32>
    %204 = arith.addf %202, %203 : vector<8x1xf32>
    %205 = math.rsqrt %204 : vector<8x1xf32>
    %206 = vector.broadcast %205 : vector<8x1xf32> to vector<8x128xf32>
    %207 = arith.mulf %199, %206 : vector<8x128xf32>
    %c0_76 = arith.constant 0 : index
    %c0_77 = arith.constant 0 : index
    %c0_78 = arith.constant 0 : index
    %208 = vector.load %arg11[%c0_76, %c0_77, %c0_78] : memref<1x8x128xf32, #tpu.memory_space<vmem>>, vector<1x8x128xf32>
    %209 = vector.shape_cast %208 : vector<1x8x128xf32> to vector<8x128xf32>
    %210 = vector.shape_cast %207 : vector<8x128xf32> to vector<1x8x128xf32>
    tpu.vector_store %arg11[%c0_76, %c0_77, %c0_78], %210 {strides = array<i32>} : memref<1x8x128xf32, #tpu.memory_space<vmem>>, vector<1x8x128xf32>,
    return
  }
  func.func @transform_0(%arg0: i32) -> (i32, i32, i32) {
    %c0_i32 = arith.constant 0 : i32
    %c0_i32_0 = arith.constant 0 : i32
    %c0_i32_1 = arith.constant 0 : i32
    return %arg0, %c0_i32, %c0_i32_0 : i32, i32, i32
  }
  func.func @transform_1(%arg0: i32) -> (i32, i32, i32) {
    %c0_i32 = arith.constant 0 : i32
    %c0_i32_0 = arith.constant 0 : i32
    %c0_i32_1 = arith.constant 0 : i32
    return %arg0, %c0_i32, %c0_i32_0 : i32, i32, i32
  }
  func.func @transform_2(%arg0: i32) -> (i32, i32, i32, i32) {
    %c0_i32 = arith.constant 0 : i32
    %c0_i32_0 = arith.constant 0 : i32
    %c0_i32_1 = arith.constant 0 : i32
    %c0_i32_2 = arith.constant 0 : i32
    return %arg0, %c0_i32, %c0_i32_0, %c0_i32_1 : i32, i32, i32, i32
  }
  func.func @transform_3(%arg0: i32) -> (i32, i32, i32, i32) {
    %c0_i32 = arith.constant 0 : i32
    %c0_i32_0 = arith.constant 0 : i32
    %c0_i32_1 = arith.constant 0 : i32
    %c0_i32_2 = arith.constant 0 : i32
    return %arg0, %c0_i32, %c0_i32_0, %c0_i32_1 : i32, i32, i32, i32
  }
  func.func @transform_4(%arg0: i32) -> (i32, i32, i32, i32) {
    %c0_i32 = arith.constant 0 : i32
    %c0_i32_0 = arith.constant 0 : i32
    %c0_i32_1 = arith.constant 0 : i32
    %c0_i32_2 = arith.constant 0 : i32
    return %arg0, %c0_i32, %c0_i32_0, %c0_i32_1 : i32, i32, i32, i32
  }
  func.func @transform_5(%arg0: i32) -> (i32, i32, i32, i32) {
    %c0_i32 = arith.constant 0 : i32
    %c0_i32_0 = arith.constant 0 : i32
    %c0_i32_1 = arith.constant 0 : i32
    %c0_i32_2 = arith.constant 0 : i32
    return %arg0, %c0_i32, %c0_i32_0, %c0_i32_1 : i32, i32, i32, i32
  }
  func.func @transform_6(%arg0: i32) -> (i32, i32, i32, i32) {
    %c0_i32 = arith.constant 0 : i32
    %c0_i32_0 = arith.constant 0 : i32
    %c0_i32_1 = arith.constant 0 : i32
    %c0_i32_2 = arith.constant 0 : i32
    return %arg0, %c0_i32, %c0_i32_0, %c0_i32_1 : i32, i32, i32, i32
  }
  func.func @transform_7(%arg0: i32) -> (i32, i32, i32, i32) {
    %c0_i32 = arith.constant 0 : i32
    %c0_i32_0 = arith.constant 0 : i32
    %c0_i32_1 = arith.constant 0 : i32
    %c0_i32_2 = arith.constant 0 : i32
    return %arg0, %c0_i32, %c0_i32_0, %c0_i32_1 : i32, i32, i32, i32
  }
  func.func @transform_8(%arg0: i32) -> (i32, i32, i32, i32) {
    %c0_i32 = arith.constant 0 : i32
    %c0_i32_0 = arith.constant 0 : i32
    %c0_i32_1 = arith.constant 0 : i32
    %c0_i32_2 = arith.constant 0 : i32
    return %arg0, %c0_i32, %c0_i32_0, %c0_i32_1 : i32, i32, i32, i32
  }
  func.func @transform_9(%arg0: i32) -> (i32, i32, i32) {
    %c0_i32 = arith.constant 0 : i32
    %c0_i32_0 = arith.constant 0 : i32
    %c0_i32_1 = arith.constant 0 : i32
    return %arg0, %c0_i32, %c0_i32_0 : i32, i32, i32
  }
  func.func @transform_10(%arg0: i32) -> (i32, i32, i32) {
    %c0_i32 = arith.constant 0 : i32
    %c0_i32_0 = arith.constant 0 : i32
    %c0_i32_1 = arith.constant 0 : i32
    return %arg0, %c0_i32, %c0_i32_0 : i32, i32, i32
  }
}

</mosaic_0001>

<bundles_post_ra>
// kernel: _catat_forward.1
= control target key start
LH: loop header
LB: loop body
LE: loop exit
PB: predicated region body
PF: predicated region fallthrough
CT: control target
= control target key end

     0   :  { %s3193_s13 = smov 0   ;;  %s3949_s0 = inlined_call_operand.vmem [shape: f32[2,48,32], index: 0, kind: input, shape index: {}]   ;;  %s3950_s1 = inlined_call_operand.vmem [shape: f32[2,48,48], index: 1, kind: input, shape index: {}]   ;;  %s3951_s2 = inlined_call_operand.vmem [shape: bf16[2,1,32,96], index: 2, kind: input, shape index: {}]   ;;  %s3952_s3 = inlined_call_operand.vmem [shape: f32[2,1,1,96], index: 3, kind: input, shape index: {}]   ;;  %s3953_s4 = inlined_call_operand.vmem [shape: bf16[2,1,32,32], index: 4, kind: input, shape index: {}]   ;;  %s3954_s5 = inlined_call_operand.vmem [shape: bf16[2,1,32,64], index: 5, kind: input, shape index: {}]   ;;  %s3955_s6 = inlined_call_operand.vmem [shape: bf16[2,1,64,32], index: 6, kind: input, shape index: {}]   ;;  %s3956_s7 = inlined_call_operand.vmem [shape: f32[2,1,6,32], index: 7, kind: input, shape index: {}]   ;;  %s3957_s8 = inlined_call_operand.vmem [shape: f32[2,1,1,64], index: 8, kind: input, shape index: {}]   ;;  %s3958_s9 = inlined_call_operand.vmem [shape: bf16[2,32,128], index: 9, kind: input, shape index: {}]   ;;  %s3959_s10 = inlined_call_operand.vmem [shape: f32[2,8,128], index: 10, kind: output, shape index: {}]  }
   0x1 LB: > { %s2508_s14 = sadd.s32 4294967295, %s3120_s13   ;;  %p2512_p0 = scmp.ge.s32.totalorder %s3120_s13, 1  ;;  %s3120_s13 = sphi %s3193_s13, %s20_s13  }
   0x2   : > { %p397_p1 = scmp.lt.s32.totalorder %s3120_s13, 3 }
   0x4   : > { %p398_p2 = pnand %p2512_p0, %p397_p1 }
   0x5   : > { %p474_p3 = scmp.lt.s32.totalorder (!%p398_p2), %s2508_s14, 1  ;;  %s3124_s26 = smov (!%p398_p2), 96  }
   0x6   : > { %401 = sbr.rel (%p398_p2) target bundleno = 3291 (0xcdb), region = 60  ;;  %s3125_s27 = smov (!%p398_p2), 88  }
   0x7   : > { %s3126_s28 = smov (!%p398_p2), 80   ;;  %s3127_s29 = smov (!%p398_p2), 120  }
   0x8   : > { %s3128_s30 = smov (!%p398_p2), 72   ;;  %s3129_s11 = smov (!%p398_p2), 112  }
   0x9   : > { %s3130_s12 = smov (!%p398_p2), 104   ;;  %s3131_s17 = smov (!%p398_p2), 64  }
   0xa   : > { %s3132_s18 = smov (!%p398_p2), 56   ;;  %s3134_s23 = smov (!%p398_p2), 40  }
   0xb   : > { %v3122_v0 = vmov 0.0   ;;  %vm3123_vm0 = vmmov 0   ;;  %s3961_s14 = smov (!%p474_p3, %s2508_s14), 1  ;;  %vm580_vm1 = vcmask 261120   ;;  %vm659_vm2 = vcmask 64512   ;;  %s3135_s24 = smov 8  }
   0xc   : > { %2667 = vmatprep.subr.bf16.mxu0 %v3122_v0  ;;  %2671 = vmatprep.mubr.msk.bf16.mxu0 %vm3123_vm0, %v3122_v0  ;;  %s3210_s15 = sshll.u32 %s3961_s14, 4  ;;  %s2902_s16 = smul.u32 48, %s3961_s14  ;;  %vm747_vm3 = vcmask 392192   ;;  %vm1699_vm4 = vcmask 130048   ;;  %vm1706_vm5 = vcmask 195584   ;;  %vm2027_vm6 = vcmask 523264  }
   0xd   : > { %2683 = vmatprep.subr.bf16.mxu1 %v3122_v0  ;;  %2689 = vmatprep.mubr.msk.bf16.mxu1 %vm3123_vm0, %v3122_v0  ;;  %s488_s19 = scalar_lea.vmem %s3951_s2, %s3210_s15  ;;  %s491_s25 = scalar_lea.vmem %s3952_s3, %s3961_s14 }
   0xe   : > { %v2972_v1 = vld [vmem:[%s488_s19 + $0x8] sm:$0xff]   ;;  %s3222_s22 = scalar_lea.vmem %s3949_s0, %s2902_s16  ;;  %v2973_v2 = vld [vmem:[%s488_s19] sm:$0xff]   ;;  %s3352_s21 = scalar_lea.vmem %s3950_s1, %s2902_s16 }
   0xf   : > { %2668 = vmatpush3.bf16.msra.mxu0 %v2972_v1  ;;  %v524_v3 = vld [vmem:[%s3222_s22] sm:$0xff]  ;;  %v525_v4 = vld [vmem:[%s3222_s22 + $0x8] sm:$0xff]  ;;  %v526_v6 = vld [vmem:[%s3222_s22 + $0x10] sm:$0xff]  ;;  %s3133_s16 = smov 48   ;;  %s501_s19 = scalar_lea.vmem %s3954_s5, %s3210_s15 }
  0x10   : > { %2669 = vmatprep.subr.bf16.mxu0 %v3122_v0  ;;  %v559_v5 = vpack.c.bf16 %v525_v4, %v524_v3  ;;  %v527_v7 = vld [vmem:[%s3222_s22 + $0x18] sm:$0xff]  ;;  %v528_v9 = vld [vmem:[%s3222_s22 + $0x20] sm:$0xff]  ;;  %v529_v10 = vld [vmem:[%s3222_s22 + $0x28] sm:$0xff]  ;;  %s2585_s20 = sshll.u32 %s3961_s14, 5 }
  0x11   : > { %v560_v8 = vpack.c.bf16 %v527_v7, %v526_v6  ;;  %v561_v11 = vpack.c.bf16 %v529_v10, %v528_v9  ;;  %v2527_v13 = vld [vmem:[%s491_s25] ss:$0 sm:$0xff] }
  0x12   : > { %v3355_v9 = vld [vmem:[%s3352_s21] sm:$0xff] }
  0x13   : > { %2670 = vmatpush3.bf16.msra.mxu0 %v2973_v2 }
  0x14   : > { %2701 = vmatprep.subr.bf16.mxu0 %v3122_v0 }
  0x16   : > { %2672 = vmatmul.mubr.msk.bf16.vlgmr.msra.gmra.mxu0 %vm580_vm1, %v559_v5 }
  0x17   : > { %2675 = vmatprep.mubr.msk.bf16.mxu0 %vm3123_vm0, %v3122_v0 }
  0x1e   : > { %2676 = vmatmul.mubr.msk.bf16.gmra.mxu0 %vm580_vm1, %v560_v8 }
  0x1f   : > { %2679 = vmatprep.mubr.msk.bf16.mxu0 %vm3123_vm0, %v3122_v0 }
  0x26   : > { %2680 = vmatmul.mubr.msk.bf16.gmra.mxu0 %vm580_vm1, %v561_v11 }
  0x27   : > { %2707 = vmatprep.mubr.msk.bf16.mxu0 %vm3123_vm0, %v3122_v0 }
  0xd6   : > { %v624_v12 = vpop.f32.mrf.mxu0 }
  0xd7   : > { %v625_v16 = vadd.f32 %v2527_v13, %v624_v12 }
  0xd8   : > { %v2673_v14 = vpop.f32.mrf.mxu0 }
  0xd9   : > { %v3361_v14 = vld [vmem:[%s3352_s21 + $0x8] sm:$0xff] }
  0xda   : > { %v627_v15 = vpop.f32.mrf.mxu0 }
  0xdb   : > { %v628_v17 = vadd.f32 %v2527_v13, %v627_v15 }
  0xdc   : > { %v2674_v18 = vpop.f32.mrf.mxu0 }
  0xdd   : > { %v3245_v19 = vpack.c.bf16 %v628_v17, %v625_v16 }
  0xde   : > { %v632_v20 = vpop.f32.mrf.mxu0 }
  0xdf   : > { %653 = vrot.lane.b32.xlu1 %v3245_v19, %s3124_s26  ;;  %v633_v32 = vadd.f32 %v2527_v13, %v632_v20 }
  0xe0   : > { %v2677_v21 = vpop.f32.mrf.mxu0 }
  0xe1   : > { %v3369_v21 = vld [vmem:[%s3352_s21 + $0x10] sm:$0xff] }
  0xe2   : > { %v635_v22 = vpop.f32.mrf.mxu0 }
  0xe3   : > { %v636_v30 = vadd.f32 %v2527_v13, %v635_v22 }
  0xe4   : > { %v2678_v23 = vpop.f32.mrf.mxu0 }
  0xe5   : > { %v3252_v33 = vpack.c.bf16 %v636_v30, %v633_v32 }
  0xe6   : > { %v640_v24 = vpop.f32.mrf.mxu0 }
  0xe7   : > { %v641_v27 = vadd.f32 %v2527_v13, %v640_v24 }
  0xe8   : > { %v2681_v25 = vpop.f32.mrf.mxu0 }
  0xea   : > { %v643_v26 = vpop.f32.mrf.mxu0 }
  0xeb   : > { %v644_v28 = vadd.f32 %v2527_v13, %v643_v26 }
  0xec   : > { %v2682_v29 = vpop.f32.mrf.mxu0 }
  0xed   : > { %v3248_v31 = vpack.c.bf16 %v644_v28, %v641_v27  ;;  %v3377_v27 = vld [vmem:[%s3352_s21 + $0x18] sm:$0xff] }
  0xef   : > { %902 = vrot.lane.b32.xlu1 %v3248_v31, %s3125_s27  ;;  %657 = vrot.lane.b32.xlu0 %v3248_v31, %s3124_s26 }
  0xf3   : > { %898 = vrot.lane.b32.xlu1 %v3245_v19, %s3125_s27  ;;  %655 = vrot.lane.b32.xlu0 %v3252_v33, %s3124_s26  ;;  %s513_s26 = scalar_lea.vmem %s3957_s8, %s3961_s14 }
  0xf7   : > { %1145 = vrot.lane.b32.xlu1 %v3248_v31, %s3126_s28  ;;  %900 = vrot.lane.b32.xlu0 %v3252_v33, %s3125_s27  ;;  %s496_s27 = scalar_lea.vmem %s3953_s4, %s3210_s15 }
  0xfb   : > { %1143 = vrot.lane.b32.xlu1 %v3252_v33, %s3126_s28  ;;  %892 = vrot.lane.b32.xlu0 %v3245_v19, %s3127_s29 }
  0xff   : > { %1141 = vrot.lane.b32.xlu1 %v3245_v19, %s3126_s28  ;;  %894 = vrot.lane.b32.xlu0 %v3252_v33, %s3127_s29  ;;  %s3136_s28 = smov 16  }
 0x103   : > { %1388 = vrot.lane.b32.xlu1 %v3248_v31, %s3128_s30  ;;  %896 = vrot.lane.b32.xlu0 %v3248_v31, %s3127_s29  ;;  %s3137_s29 = smov 24  }
 0x107   : > { %1386 = vrot.lane.b32.xlu1 %v3252_v33, %s3128_s30  ;;  %1135 = vrot.lane.b32.xlu0 %v3245_v19, %s3129_s11 }
 0x10b   : > { %1384 = vrot.lane.b32.xlu1 %v3245_v19, %s3128_s30  ;;  %1137 = vrot.lane.b32.xlu0 %v3252_v33, %s3129_s11  ;;  %s2523_s30 = sshll.u32 %s3961_s14, 3 }
 0x10f   : > { %1380 = vrot.lane.b32.xlu1 %v3252_v33, %s3130_s12  ;;  %1139 = vrot.lane.b32.xlu0 %v3248_v31, %s3129_s11 }
 0x113   : > { %819 = vrot.lane.b32.xlu1 %v3252_v33, %s3131_s17  ;;  %1378 = vrot.lane.b32.xlu0 %v3245_v19, %s3130_s12 }
 0x117   : > { %1064 = vrot.lane.b32.xlu1 %v3248_v31, %s3132_s18  ;;  %1382 = vrot.lane.b32.xlu0 %v3248_v31, %s3130_s12  ;;  %s522_s12 = scalar_lea.vmem %s3959_s10, %s2523_s30 }
 0x11b   : > { %817 = vrot.lane.b32.xlu0 %v3245_v19, %s3131_s17 }
 0x11f   : > { %1062 = vrot.lane.b32.xlu0 %v3252_v33, %s3132_s18 }
 0x123   : > { %821 = vrot.lane.b32.xlu0 %v3248_v31, %s3131_s17  ;;  %s510_s17 = scalar_lea.vmem %s3956_s7, %s2523_s30 }
 0x151   : > { %v654_v34 = vpop.permute.xlu1 %653 }
 0x152   : > { %v670_v45 = vsel %vm659_vm2, %v654_v34, 0 }
 0x161   : > { %v658_v35 = vpop.permute.xlu0 %657  ;;  %v903_v37 = vpop.permute.xlu1 %902 }
 0x162   : > { %v676_v36 = vsel %vm659_vm2, %v658_v35, 0  ;;  %v920_v49 = vsel %vm659_vm2, %v903_v37, 0  ;;  %v3385_v35 = vld [vmem:[%s3352_s21 + $0x20] sm:$0xff] }
 0x163   : > { %2684 = vmatpush3.bf16.xpose.msra.mxu1 %v676_v36 }
 0x164   : > { %2685 = vmatprep.subr.bf16.mxu1 %v3122_v0 }
 0x165   : > { %v656_v38 = vpop.permute.xlu0 %655  ;;  %v899_v39 = vpop.permute.xlu1 %898 }
 0x166   : > { %v673_v41 = vsel %vm659_vm2, %v656_v38, 0  ;;  %v914_v58 = vsel %vm659_vm2, %v899_v39, 0 }
 0x169   : > { %v901_v40 = vpop.permute.xlu0 %900  ;;  %v1146_v43 = vpop.permute.xlu1 %1145 }
 0x16a   : > { %v917_v54 = vsel %vm659_vm2, %v901_v40, 0  ;;  %v1163_v62 = vsel %vm659_vm2, %v1146_v43, 0 }
 0x16b   : > { %2686 = vmatpush3.bf16.xpose.msra.mxu1 %v673_v41  ;;  %v3393_v41 = vld [vmem:[%s3352_s21 + $0x28] sm:$0xff] }
 0x16c   : > { %2687 = vmatprep.subr.bf16.mxu1 %v3122_v0 }
 0x16d   : > { %v893_v42 = vpop.permute.xlu0 %892  ;;  %v1144_v46 = vpop.permute.xlu1 %1143 }
 0x16e   : > { %v1160_v3 = vsel %vm659_vm2, %v1144_v46, 0 }
 0x171   : > { %v895_v44 = vpop.permute.xlu0 %894  ;;  %v1142_v50 = vpop.permute.xlu1 %1141 }
 0x172   : > { %v1157_v4 = vsel %vm659_vm2, %v1142_v50, 0 }
 0x173   : > { %2688 = vmatpush3.bf16.xpose.msra.mxu1 %v670_v45 }
 0x174   : > { %2719 = vmatprep.subr.bf16.mxu1 %v3122_v0 }
 0x175   : > { %v897_v47 = vpop.permute.xlu0 %896  ;;  %v1389_v52 = vpop.permute.xlu1 %1388 }
 0x176   : > { %v1406_v5 = vsel %vm659_vm2, %v1389_v52, 0 }
 0x179   : > { %v1136_v48 = vpop.permute.xlu0 %1135  ;;  %v1387_v56 = vpop.permute.xlu1 %1386 }
 0x17a   : > { %2690 = vmatmul.mubr.msk.bf16.vlgmr.msra.gmra.mxu1 %vm659_vm2, %v3245_v19  ;;  %v1403_v6 = vsel %vm659_vm2, %v1387_v56, 0 }
 0x17b   : > { %2720 = vmatpush3.bf16.xpose.msra.mxu1 %v920_v49  ;;  %2693 = vmatprep.mubr.msk.bf16.mxu1 %vm3123_vm0, %v3122_v0 }
 0x17c   : > { %2721 = vmatprep.subr.bf16.mxu1 %v3122_v0 }
 0x17d   : > { %v1138_v51 = vpop.permute.xlu0 %1137  ;;  %v1385_v59 = vpop.permute.xlu1 %1384 }
 0x17e   : > { %v1400_v7 = vsel %vm659_vm2, %v1385_v59, 0 }
 0x181   : > { %v1140_v53 = vpop.permute.xlu0 %1139  ;;  %v1381_v63 = vpop.permute.xlu1 %1380 }
 0x182   : > { %2694 = vmatmul.mubr.msk.bf16.gmra.mxu1 %vm659_vm2, %v3252_v33 }
 0x183   : > { %2722 = vmatpush3.bf16.xpose.msra.mxu1 %v917_v54  ;;  %2697 = vmatprep.mubr.msk.bf16.mxu1 %vm3123_vm0, %v3122_v0 }
 0x184   : > { %2723 = vmatprep.subr.bf16.mxu1 %v3122_v0 }
 0x185   : > { %v1379_v55 = vpop.permute.xlu0 %1378  ;;  %v820_v2 = vpop.permute.xlu1 %819 }
 0x189   : > { %v1383_v57 = vpop.permute.xlu0 %1382 }
 0x18a   : > { %2698 = vmatmul.mubr.msk.bf16.gmra.mxu1 %vm659_vm2, %v3248_v31 }
 0x18b   : > { %2724 = vmatpush3.bf16.xpose.msra.mxu1 %v914_v58  ;;  %2725 = vmatprep.mubr.msk.bf16.mxu1 %vm3123_vm0, %v3122_v0 }
 0x18c   : > { %2755 = vmatprep.subr.bf16.mxu1 %v3122_v0 }
 0x18d   : > { %v818_v60 = vpop.permute.xlu0 %817 }
 0x191   : > { %v3303_v61 = vpop.permute.xlu0 %1062 }
 0x192   : > { %2726 = vmatmul.mubr.msk.bf16.vlgmr.msra.gmra.mxu1 %vm659_vm2, %v893_v42 }
 0x193   : > { %2756 = vmatpush3.bf16.xpose.msra.mxu1 %v1163_v62  ;;  %2729 = vmatprep.mubr.msk.bf16.mxu1 %vm3123_vm0, %v3122_v0 }
 0x194   : > { %2757 = vmatprep.subr.bf16.mxu1 %v3122_v0 }
 0x195   : > { %v822_v1 = vpop.permute.xlu0 %821 }
 0x196   : > { %2702 = vmatpush3.bf16.msra.mxu0 %v822_v1 }
 0x197   : > { %2703 = vmatprep.subr.bf16.mxu0 %v3122_v0 }
 0x19a   : > { %2704 = vmatpush3.bf16.msra.mxu0 %v820_v2  ;;  %2730 = vmatmul.mubr.msk.bf16.gmra.mxu1 %vm659_vm2, %v895_v44 }
 0x19b   : > { %2758 = vmatpush3.bf16.xpose.msra.mxu1 %v1160_v3  ;;  %2705 = vmatprep.subr.bf16.mxu0 %v3122_v0 }
 0x19c   : > { %2733 = vmatprep.mubr.msk.bf16.mxu1 %vm3123_vm0, %v3122_v0  ;;  %2759 = vmatprep.subr.bf16.mxu1 %v3122_v0 }
 0x19e   : > { %2706 = vmatpush3.bf16.msra.mxu0 %v818_v60 }
 0x19f   : > { %2737 = vmatprep.subr.bf16.mxu0 %v3122_v0 }
 0x1a2   : > { %2734 = vmatmul.mubr.msk.bf16.gmra.mxu1 %vm659_vm2, %v897_v47 }
 0x1a3   : > { %2760 = vmatpush3.bf16.xpose.msra.mxu1 %v1157_v4  ;;  %2761 = vmatprep.mubr.msk.bf16.mxu1 %vm3123_vm0, %v3122_v0 }
 0x1a4   : > { %2791 = vmatprep.subr.bf16.mxu1 %v3122_v0 }
 0x1aa   : > { %2762 = vmatmul.mubr.msk.bf16.vlgmr.msra.gmra.mxu1 %vm659_vm2, %v1136_v48 }
 0x1ab   : > { %2792 = vmatpush3.bf16.xpose.msra.mxu1 %v1406_v5  ;;  %2765 = vmatprep.mubr.msk.bf16.mxu1 %vm3123_vm0, %v3122_v0 }
 0x1ac   : > { %2793 = vmatprep.subr.bf16.mxu1 %v3122_v0 }
 0x1b2   : > { %2766 = vmatmul.mubr.msk.bf16.gmra.mxu1 %vm659_vm2, %v1138_v51 }
 0x1b3   : > { %2794 = vmatpush3.bf16.xpose.msra.mxu1 %v1403_v6  ;;  %2769 = vmatprep.mubr.msk.bf16.mxu1 %vm3123_vm0, %v3122_v0 }
 0x1b4   : > { %2795 = vmatprep.subr.bf16.mxu1 %v3122_v0 }
 0x1ba   : > { %2770 = vmatmul.mubr.msk.bf16.gmra.mxu1 %vm659_vm2, %v1140_v53 }
 0x1bb   : > { %2796 = vmatpush3.bf16.xpose.msra.mxu1 %v1400_v7  ;;  %2797 = vmatprep.mubr.msk.bf16.mxu1 %vm3123_vm0, %v3122_v0 }
 0x1bc   : > { %2827 = vmatprep.subr.bf16.mxu1 %v3122_v0 }
 0x1c2   : > { %2798 = vmatmul.mubr.msk.bf16.vlgmr.msra.gmra.mxu1 %vm659_vm2, %v1379_v55 }
 0x1c3   : > { %2801 = vmatprep.mubr.msk.bf16.mxu1 %vm3123_vm0, %v3122_v0 }
 0x1ca   : > { %2802 = vmatmul.mubr.msk.bf16.gmra.mxu1 %vm659_vm2, %v1381_v63 }
 0x1cb   : > { %2805 = vmatprep.mubr.msk.bf16.mxu1 %vm3123_vm0, %v3122_v0 }
 0x1d2   : > { %2806 = vmatmul.mubr.msk.bf16.gmra.mxu1 %vm659_vm2, %v1383_v57 }
 0x1d3   : > { %2831 = vmatprep.mubr.msk.bf16.mxu1 %vm3123_vm0, %v3122_v0 }
 0x23a   : > { %v712_v8 = vpop.f32.mrf.mxu1 }
 0x23b   : > { %v735_v10 = vmul.f32 0.35355338, %v712_v8 }
 0x23c   : > { %v2691_v11 = vpop.f32.mrf.mxu1 }
 0x23d   : > { %v3358_v12 = vadd.f32 %v735_v10, %v3355_v9 }
 0x23e   : > { %v715_v13 = vpop.f32.mrf.mxu1 }
 0x23f   : > { %v736_v15 = vmul.f32 0.35355338, %v715_v13  ;;  %v748_v16 = vsel %vm747_vm3, %v3358_v12, -inf }
 0x240   : > { %749 = vmax.xlane.f32.xlu1 %v748_v16  ;;  %v2692_v17 = vpop.f32.mrf.mxu1 }
 0x241   : > { %v3366_v18 = vadd.f32 %v736_v15, %v3361_v14 }
 0x242   : > { %v720_v20 = vpop.f32.mrf.mxu1 }
 0x243   : > { %v737_v22 = vmul.f32 0.35355338, %v720_v20  ;;  %v751_v23 = vsel %vm747_vm3, %v3366_v18, -inf }
 0x244   : > { %752 = vmax.xlane.f32.xlu0 %v751_v23  ;;  %v2695_v24 = vpop.f32.mrf.mxu1 }
 0x245   : > { %v3374_v25 = vadd.f32 %v737_v22, %v3369_v21 }
 0x246   : > { %v723_v26 = vpop.f32.mrf.mxu1 }
 0x247   : > { %v738_v28 = vmul.f32 0.35355338, %v723_v26  ;;  %v754_v29 = vsel %vm747_vm3, %v3374_v25, -inf }
 0x248   : > { %755 = vmax.xlane.f32.xlu0 %v754_v29  ;;  %v2696_v30 = vpop.f32.mrf.mxu1 }
 0x249   : > { %v3382_v32 = vadd.f32 %v738_v28, %v3377_v27 }
 0x24a   : > { %v728_v34 = vpop.f32.mrf.mxu1 }
 0x24b   : > { %v739_v36 = vmul.f32 0.35355338, %v728_v34  ;;  %v757_v37 = vsel %vm747_vm3, %v3382_v32, -inf }
 0x24c   : > { %758 = vmax.xlane.f32.xlu1 %v757_v37  ;;  %v2699_v38 = vpop.f32.mrf.mxu1 }
 0x24d   : > { %v3390_v39 = vadd.f32 %v739_v36, %v3385_v35 }
 0x24e   : > { %v731_v40 = vpop.f32.mrf.mxu1 }
 0x24f   : > { %v740_v42 = vmul.f32 0.35355338, %v731_v40  ;;  %v760_v43 = vsel %vm747_vm3, %v3390_v39, -inf }
 0x250   : > { %761 = vmax.xlane.f32.xlu0 %v760_v43  ;;  %v2700_v44 = vpop.f32.mrf.mxu1 }
 0x251   : > { %v3398_v45 = vadd.f32 %v740_v42, %v3393_v41 }
 0x252   : > { %v956_v46 = vpop.f32.mrf.mxu1 }
 0x253   : > { %v979_v47 = vmul.f32 0.35355338, %v956_v46  ;;  %v763_v48 = vsel %vm747_vm3, %v3398_v45, -inf }
 0x254   : > { %764 = vmax.xlane.f32.xlu1 %v763_v48  ;;  %v2727_v49 = vpop.f32.mrf.mxu1 }
 0x255   : > { %v3403_v50 = vadd.f32 %v979_v47, %v3355_v9 }
 0x256   : > { %v959_v51 = vpop.f32.mrf.mxu1 }
 0x257   : > { %v980_v52 = vmul.f32 0.35355338, %v959_v51  ;;  %v991_v53 = vsel %vm747_vm3, %v3403_v50, -inf }
 0x258   : > { %992 = vmax.xlane.f32.xlu0 %v991_v53  ;;  %v2728_v54 = vpop.f32.mrf.mxu1 }
 0x259   : > { %v3408_v55 = vadd.f32 %v980_v52, %v3361_v14 }
 0x25a   : > { %v964_v56 = vpop.f32.mrf.mxu1 }
 0x25b   : > { %v981_v57 = vmul.f32 0.35355338, %v964_v56  ;;  %v994_v58 = vsel %vm747_vm3, %v3408_v55, -inf }
 0x25c   : > { %995 = vmax.xlane.f32.xlu1 %v994_v58  ;;  %v2731_v59 = vpop.f32.mrf.mxu1 }
 0x25d   : > { %v3413_v60 = vadd.f32 %v981_v57, %v3369_v21 }
 0x25e   : > { %v967_v62 = vpop.f32.mrf.mxu1 }
 0x25f   : > { %v982_v63 = vmul.f32 0.35355338, %v967_v62  ;;  %v997_v1 = vsel %vm747_vm3, %v3413_v60, -inf }
 0x260   : > { %998 = vmax.xlane.f32.xlu0 %v997_v1  ;;  %v2732_v2 = vpop.f32.mrf.mxu1 }
 0x261   : > { %v3418_v3 = vadd.f32 %v982_v63, %v3377_v27 }
 0x262   : > { %v972_v4 = vpop.f32.mrf.mxu1 }
 0x263   : > { %v983_v5 = vmul.f32 0.35355338, %v972_v4  ;;  %v1000_v6 = vsel %vm747_vm3, %v3418_v3, -inf }
 0x264   : > { %1001 = vmax.xlane.f32.xlu1 %v1000_v6  ;;  %v2735_v7 = vpop.f32.mrf.mxu1 }
 0x265   : > { %v3423_v8 = vadd.f32 %v983_v5, %v3385_v35 }
 0x266   : > { %v975_v10 = vpop.f32.mrf.mxu1 }
 0x267   : > { %v984_v11 = vmul.f32 0.35355338, %v975_v10  ;;  %v1003_v13 = vsel %vm747_vm3, %v3423_v8, -inf }
 0x268   : > { %1004 = vmax.xlane.f32.xlu0 %v1003_v13  ;;  %v2736_v15 = vpop.f32.mrf.mxu1 }
 0x269   : > { %v3428_v16 = vadd.f32 %v984_v11, %v3393_v41 }
 0x26a   : > { %v1199_v17 = vpop.f32.mrf.mxu1 }
 0x26b   : > { %v1222_v20 = vmul.f32 0.35355338, %v1199_v17  ;;  %v1006_v22 = vsel %vm747_vm3, %v3428_v16, -inf }
 0x26c   : > { %1007 = vmax.xlane.f32.xlu1 %v1006_v22  ;;  %v2763_v23 = vpop.f32.mrf.mxu1 }
 0x26d   : > { %v3433_v24 = vadd.f32 %v1222_v20, %v3355_v9 }
 0x26e   : > { %v1202_v26 = vpop.f32.mrf.mxu1 }
 0x26f   : > { %v1234_v28 = vsel %vm747_vm3, %v3433_v24, -inf  ;;  %v1223_v59 = vmul.f32 0.35355338, %v1202_v26 }
 0x270   : > { %1235 = vmax.xlane.f32.xlu0 %v1234_v28  ;;  %v2764_v29 = vpop.f32.mrf.mxu1 }
 0x271   : > { %v3444_v63 = vadd.f32 %v1223_v59, %v3361_v14 }
 0x272   : > { %v1207_v30 = vpop.f32.mrf.mxu1 }
 0x273   : > { %v1224_v62 = vmul.f32 0.35355338, %v1207_v30  ;;  %v1237_v6 = vsel %vm747_vm3, %v3444_v63, -inf }
 0x274   : > { %v2767_v34 = vpop.f32.mrf.mxu1 }
 0x275   : > { %v3447_v4 = vadd.f32 %v1224_v62, %v3369_v21 }
 0x276   : > { %v1210_v36 = vpop.f32.mrf.mxu1 }
 0x277   : > { %v1225_v1 = vmul.f32 0.35355338, %v1210_v36  ;;  %v1240_v10 = vsel %vm747_vm3, %v3447_v4, -inf }
 0x278   : > { %v2768_v37 = vpop.f32.mrf.mxu1 }
 0x279   : > { %v3454_v11 = vadd.f32 %v1225_v1, %v3377_v27 }
 0x27a   : > { %v1215_v38 = vpop.f32.mrf.mxu1 }
 0x27b   : > { %v1226_v2 = vmul.f32 0.35355338, %v1215_v38  ;;  %v1243_v22 = vsel %vm747_vm3, %v3454_v11, -inf }
 0x27c   : > { %v2771_v40 = vpop.f32.mrf.mxu1 }
 0x27d   : > { %1307 = vrot.lane.b32.xlu1 %v3248_v31, %s3133_s16  ;;  %v3457_v13 = vadd.f32 %v1226_v2, %v3385_v35 }
 0x27e   : > { %v1218_v42 = vpop.f32.mrf.mxu1 }
 0x27f   : > { %v1227_v5 = vmul.f32 0.35355338, %v1218_v42  ;;  %v1246_v23 = vsel %vm747_vm3, %v3457_v13, -inf }
 0x280   : > { %v2772_v43 = vpop.f32.mrf.mxu1 }
 0x281   : > { %1305 = vrot.lane.b32.xlu1 %v3252_v33, %s3133_s16  ;;  %v3460_v17 = vadd.f32 %v1227_v5, %v3393_v41 }
 0x282   : > { %v1442_v44 = vpop.f32.mrf.mxu1 }
 0x283   : > { %v1465_v7 = vmul.f32 0.35355338, %v1442_v44  ;;  %v1249_v28 = vsel %vm747_vm3, %v3460_v17, -inf }
 0x284   : > { %v2799_v46 = vpop.f32.mrf.mxu1 }
 0x285   : > { %v3467_v26 = vadd.f32 %v1465_v7, %v3355_v9  ;;  %v3498_v46 = vpop.permute.xlu1 %1064 }
 0x286   : > { %1060 = vrot.lane.b32.xlu0 %v3245_v19, %s3132_s18  ;;  %v1445_v47 = vpop.f32.mrf.mxu1 }
 0x287   : > { %v1466_v15 = vmul.f32 0.35355338, %v1445_v47  ;;  %v1477_v36 = vsel %vm747_vm3, %v3467_v26, -inf }
 0x288   : > { %v2800_v48 = vpop.f32.mrf.mxu1 }
 0x289   : > { %v3472_v29 = vadd.f32 %v1466_v15, %v3361_v14 }
 0x28a   : > { %v1450_v49 = vpop.f32.mrf.mxu1 }
 0x28b   : > { %v1467_v20 = vmul.f32 0.35355338, %v1450_v49  ;;  %v1480_v9 = vsel %vm747_vm3, %v3472_v29, -inf }
 0x28c   : > { %v2803_v51 = vpop.f32.mrf.mxu1 }
 0x28d   : > { %v3477_v37 = vadd.f32 %v1467_v20, %v3369_v21 }
 0x28e   : > { %v1453_v52 = vpop.f32.mrf.mxu1 }
 0x28f   : > { %v1468_v30 = vmul.f32 0.35355338, %v1453_v52  ;;  %v1483_v40 = vsel %vm747_vm3, %v3477_v37, -inf }
 0x290   : > { %v2804_v53 = vpop.f32.mrf.mxu1 }
 0x291   : > { %v3484_v14 = vadd.f32 %v1468_v30, %v3377_v27 }
 0x292   : > { %v1458_v54 = vpop.f32.mrf.mxu1 }
 0x293   : > { %v1469_v34 = vmul.f32 0.35355338, %v1458_v54  ;;  %v1486_v21 = vsel %vm747_vm3, %v3484_v14, -inf }
 0x294   : > { %v2807_v56 = vpop.f32.mrf.mxu1 }
 0x295   : > { %v3487_v42 = vadd.f32 %v1469_v34, %v3385_v35 }
 0x296   : > { %v1461_v57 = vpop.f32.mrf.mxu1 }
 0x297   : > { %v1470_v38 = vmul.f32 0.35355338, %v1461_v57  ;;  %v1489_v43 = vsel %vm747_vm3, %v3487_v42, -inf }
 0x298   : > { %v2808_v58 = vpop.f32.mrf.mxu1 }
 0x299   : > { %v3494_v44 = vadd.f32 %v1470_v38, %v3393_v41 }
 0x29b   : > { %v1492_v27 = vsel %vm747_vm3, %v3494_v44, -inf }
 0x2a5   : > { %1238 = vmax.xlane.f32.xlu1 %v1237_v6  ;;  %1241 = vmax.xlane.f32.xlu0 %v1240_v10 }
 0x2a9   : > { %1244 = vmax.xlane.f32.xlu1 %v1243_v22  ;;  %1247 = vmax.xlane.f32.xlu0 %v1246_v23 }
 0x2ad   : > { %1250 = vmax.xlane.f32.xlu1 %v1249_v28  ;;  %1478 = vmax.xlane.f32.xlu0 %v1477_v36 }
 0x2b1   : > { %1481 = vmax.xlane.f32.xlu1 %v1480_v9  ;;  %1484 = vmax.xlane.f32.xlu0 %v1483_v40 }
 0x2b5   : > { %1487 = vmax.xlane.f32.xlu1 %v1486_v21  ;;  %1490 = vmax.xlane.f32.xlu0 %v1489_v43 }
 0x2b9   : > { %1493 = vmax.xlane.f32.xlu1 %v1492_v27 }
 0x2c9   : > { %v750_v35 = vpop.xlane.xlu1 %749 }
 0x2ca   : > { %v766_v47 = vsub.f32 %v3358_v12, %v750_v35 }
 0x2cc   : > { %v772_v48 = vmul.f32 1.442695, %v766_v47 }
 0x2cd   : > { %v753_v49 = vpop.xlane.xlu0 %752 }
 0x2ce   : > { %2984 = vpow2.f32 %v772_v48  ;;  %v767_v51 = vsub.f32 %v3366_v18, %v753_v49 }
 0x2d0   : > { %v774_v52 = vmul.f32 1.442695, %v767_v51 }
 0x2d1   : > { %v756_v53 = vpop.xlane.xlu0 %755 }
 0x2d2   : > { %2986 = vpow2.f32 %v774_v52  ;;  %v768_v41 = vsub.f32 %v3374_v25, %v756_v53 }
 0x2d4   : > { %v776_v54 = vmul.f32 1.442695, %v768_v41 }
 0x2d5   : > { %v759_v56 = vpop.xlane.xlu1 %758 }
 0x2d6   : > { %2988 = vpow2.f32 %v776_v54  ;;  %v769_v57 = vsub.f32 %v3382_v32, %v759_v56 }
 0x2d8   : > { %v778_v58 = vmul.f32 1.442695, %v769_v57 }
 0x2d9   : > { %v762_v59 = vpop.xlane.xlu0 %761 }
 0x2da   : > { %2990 = vpow2.f32 %v778_v58  ;;  %v770_v12 = vsub.f32 %v3390_v39, %v762_v59 }
 0x2db   : > { %v3505_v62 = vpop.eup %2984 }
 0x2dc   : > { %v780_v1 = vmul.f32 1.442695, %v770_v12  ;;  %v784_v18 = vsel %vm747_vm3, %v3505_v62, 0.0 }
 0x2dd   : > { %v765_v2 = vpop.xlane.xlu1 %764  ;;  %785 = vadd.xlane.f32.xlu0 %v784_v18 }
 0x2de   : > { %2992 = vpow2.f32 %v780_v1  ;;  %v771_v25 = vsub.f32 %v3398_v45, %v765_v2 }
 0x2df   : > { %v3510_v5 = vpop.eup %2986 }
 0x2e0   : > { %v782_v6 = vmul.f32 1.442695, %v771_v25  ;;  %v787_v32 = vsel %vm747_vm3, %v3510_v5, 0.0 }
 0x2e1   : > { %788 = vadd.xlane.f32.xlu1 %v787_v32  ;;  %v993_v7 = vpop.xlane.xlu0 %992 }
 0x2e2   : > { %2994 = vpow2.f32 %v782_v6  ;;  %v1009_v39 = vsub.f32 %v3403_v50, %v993_v7 }
 0x2e3   : > { %v3515_v10 = vpop.eup %2988 }
 0x2e4   : > { %v1015_v15 = vmul.f32 1.442695, %v1009_v39  ;;  %v790_v20 = vsel %vm747_vm3, %v3515_v10, 0.0 }
 0x2e5   : > { %v996_v22 = vpop.xlane.xlu1 %995  ;;  %791 = vadd.xlane.f32.xlu0 %v790_v20 }
 0x2e6   : > { %2996 = vpow2.f32 %v1015_v15  ;;  %v1010_v45 = vsub.f32 %v3408_v55, %v996_v22 }
 0x2e7   : > { %v3520_v23 = vpop.eup %2990 }
 0x2e8   : > { %v1017_v28 = vmul.f32 1.442695, %v1010_v45  ;;  %v793_v30 = vsel %vm747_vm3, %v3520_v23, 0.0 }
 0x2e9   : > { %794 = vadd.xlane.f32.xlu1 %v793_v30  ;;  %v999_v34 = vpop.xlane.xlu0 %998 }
 0x2ea   : > { %2998 = vpow2.f32 %v1017_v28  ;;  %v1011_v50 = vsub.f32 %v3413_v60, %v999_v34 }
 0x2eb   : > { %v3525_v36 = vpop.eup %2992 }
 0x2ec   : > { %v1019_v9 = vmul.f32 1.442695, %v1011_v50  ;;  %v796_v38 = vsel %vm747_vm3, %v3525_v36, 0.0 }
 0x2ed   : > { %v1002_v40 = vpop.xlane.xlu1 %1001  ;;  %797 = vadd.xlane.f32.xlu0 %v796_v38 }
 0x2ee   : > { %3000 = vpow2.f32 %v1019_v9  ;;  %v1012_v55 = vsub.f32 %v3418_v3, %v1002_v40 }
 0x2ef   : > { %v3530_v21 = vpop.eup %2994 }
 0x2f0   : > { %v1021_v43 = vmul.f32 1.442695, %v1012_v55  ;;  %v799_v27 = vsel %vm747_vm3, %v3530_v21, 0.0 }
 0x2f1   : > { %800 = vadd.xlane.f32.xlu1 %v799_v27  ;;  %v1005_v35 = vpop.xlane.xlu0 %1004 }
 0x2f2   : > { %3002 = vpow2.f32 %v1021_v43  ;;  %v1013_v60 = vsub.f32 %v3423_v8, %v1005_v35 }
 0x2f3   : > { %v3535_v47 = vpop.eup %2996 }
 0x2f4   : > { %v1023_v48 = vmul.f32 1.442695, %v1013_v60  ;;  %v1027_v49 = vsel %vm747_vm3, %v3535_v47, 0.0 }
 0x2f5   : > { %v1008_v51 = vpop.xlane.xlu1 %1007  ;;  %1028 = vadd.xlane.f32.xlu1 %v1027_v49 }
 0x2f6   : > { %3004 = vpow2.f32 %v1023_v48  ;;  %v1014_v3 = vsub.f32 %v3428_v16, %v1008_v51 }
 0x2f7   : > { %v3540_v52 = vpop.eup %2998 }
 0x2f8   : > { %v1025_v53 = vmul.f32 1.442695, %v1014_v3  ;;  %v1030_v41 = vsel %vm747_vm3, %v3540_v52, 0.0 }
 0x2f9   : > { %1031 = vadd.xlane.f32.xlu0 %v1030_v41  ;;  %v1236_v54 = vpop.xlane.xlu0 %1235  ;;  %v3569_v6 = vpop.permute.xlu1 %1307 }
 0x2fa   : > { %3006 = vpow2.f32 %v1025_v53  ;;  %v1252_v8 = vsub.f32 %v3433_v24, %v1236_v54 }
 0x2fb   : > { %v3545_v56 = vpop.eup %3000 }
 0x2fc   : > { %v1258_v57 = vmul.f32 1.442695, %v1252_v8  ;;  %v1033_v58 = vsel %vm747_vm3, %v3545_v56, 0.0 }
 0x2fd   : > { %1034 = vadd.xlane.f32.xlu1 %v1033_v58  ;;  %v3571_v32 = vpop.permute.xlu1 %1305  ;;  %v3573_v7 = vpop.permute.xlu0 %1060 }
 0x2fe   : > { %3008 = vpow2.f32 %v1258_v57 }
 0x2ff   : > { %v3549_v16 = vpop.eup %3002 }
 0x300   : > { %v1036_v59 = vsel %vm747_vm3, %v3549_v16, 0.0 }
 0x301   : > { %1037 = vadd.xlane.f32.xlu1 %v1036_v59 }
 0x303   : > { %v3553_v12 = vpop.eup %3004 }
 0x304   : > { %v1039_v1 = vsel %vm747_vm3, %v3553_v12, 0.0 }
 0x305   : > { %1040 = vadd.xlane.f32.xlu1 %v1039_v1 }
 0x307   : > { %v3557_v24 = vpop.eup %3006 }
 0x308   : > { %v1042_v18 = vsel %vm747_vm3, %v3557_v24, 0.0 }
 0x309   : > { %1043 = vadd.xlane.f32.xlu1 %v1042_v18 }
 0x30b   : > { %v3561_v2 = vpop.eup %3008 }
 0x30c   : > { %v1270_v25 = vsel %vm747_vm3, %v3561_v2, 0.0 }
 0x30d   : > { %1271 = vadd.xlane.f32.xlu0 %v1270_v25 }
 0x31a   : > { %1550 = vrot.lane.b32.xlu1 %v3248_v31, %s3134_s23 }
 0x323   : > { %1303 = vrot.lane.b32.xlu0 %v3245_v19, %s3133_s16 }
 0x32e   : > { %v1239_v39 = vpop.xlane.xlu1 %1238  ;;  %v1242_v15 = vpop.xlane.xlu0 %1241 }
 0x32f   : > { %v1253_v20 = vsub.f32 %v3444_v63, %v1239_v39  ;;  %v1254_v22 = vsub.f32 %v3447_v4, %v1242_v15 }
 0x331   : > { %v1260_v45 = vmul.f32 1.442695, %v1253_v20  ;;  %v1262_v28 = vmul.f32 1.442695, %v1254_v22 }
 0x332   : > { %v1245_v30 = vpop.xlane.xlu1 %1244  ;;  %v1248_v34 = vpop.xlane.xlu0 %1247 }
 0x333   : > { %3010 = vpow2.f32 %v1260_v45  ;;  %v1255_v31 = vsub.f32 %v3454_v11, %v1245_v30  ;;  %v1256_v9 = vsub.f32 %v3457_v13, %v1248_v34 }
 0x334   : > { %3012 = vpow2.f32 %v1262_v28 }
 0x335   : > { %v1264_v50 = vmul.f32 1.442695, %v1255_v31  ;;  %v1266_v63 = vmul.f32 1.442695, %v1256_v9 }
 0x336   : > { %v1251_v38 = vpop.xlane.xlu1 %1250  ;;  %v1479_v40 = vpop.xlane.xlu0 %1478 }
 0x337   : > { %v1257_v55 = vsub.f32 %v3460_v17, %v1251_v38  ;;  %v1495_v43 = vsub.f32 %v3467_v26, %v1479_v40  ;;  %3014 = vpow2.f32 %v1264_v50 }
 0x339   : > { %v1268_v4 = vmul.f32 1.442695, %v1257_v55  ;;  %v1501_v48 = vmul.f32 1.442695, %v1495_v43 }
 0x33a   : > { %v1482_v27 = vpop.xlane.xlu1 %1481  ;;  %v1485_v35 = vpop.xlane.xlu0 %1484 }
 0x33b   : > { %3016 = vpow2.f32 %v1268_v4  ;;  %v1496_v60 = vsub.f32 %v3472_v29, %v1482_v27  ;;  %v1497_v11 = vsub.f32 %v3477_v37, %v1485_v35 }
 0x33c   : > { %3018 = vpow2.f32 %v1266_v63 }
 0x33d   : > { %v1503_v49 = vmul.f32 1.442695, %v1496_v60  ;;  %v1505_v13 = vmul.f32 1.442695, %v1497_v11 }
 0x33e   : > { %v1488_v51 = vpop.xlane.xlu1 %1487  ;;  %v1491_v3 = vpop.xlane.xlu0 %1490 }
 0x33f   : > { %3020 = vpow2.f32 %v1503_v49  ;;  %v1498_v17 = vsub.f32 %v3484_v14, %v1488_v51  ;;  %v1499_v41 = vsub.f32 %v3487_v42, %v1491_v3 }
 0x340   : > { %v3584_v26 = vpop.eup %3010  ;;  %3022 = vpow2.f32 %v1501_v48 }
 0x341   : > { %3024 = vpow2.f32 %v1505_v13  ;;  %v1507_v53 = vmul.f32 1.442695, %v1498_v17  ;;  %v1273_v29 = vsel %vm747_vm3, %v3584_v26, 0.0  ;;  %v3589_v37 = vpop.eup %3012  ;;  %v1509_v8 = vmul.f32 1.442695, %v1499_v41 }
 0x342   : > { %v1494_v54 = vpop.xlane.xlu1 %1493  ;;  %1274 = vadd.xlane.f32.xlu1 %v1273_v29  ;;  %v1276_v14 = vsel %vm747_vm3, %v3589_v37, 0.0 }
 0x343   : > { %3026 = vpow2.f32 %v1507_v53  ;;  %v1500_v57 = vsub.f32 %v3494_v44, %v1494_v54 }
 0x344   : > { %v3594_v58 = vpop.eup %3014  ;;  %3028 = vpow2.f32 %v1509_v8 }
 0x345   : > { %v1511_v42 = vmul.f32 1.442695, %v1500_v57  ;;  %v1279_v18 = vsel %vm747_vm3, %v3594_v58, 0.0 }
 0x346   : > { %1277 = vadd.xlane.f32.xlu1 %v1276_v14 }
 0x347   : > { %3030 = vpow2.f32 %v1511_v42 }
 0x348   : > { %v3596_v59 = vpop.eup %3016 }
 0x349   : > { %v1285_v1 = vsel %vm747_vm3, %v3596_v59, 0.0  ;;  %v3602_v25 = vpop.eup %3018 }
 0x34a   : > { %1286 = vadd.xlane.f32.xlu0 %v1285_v1  ;;  %1280 = vadd.xlane.f32.xlu1 %v1279_v18  ;;  %v1282_v20 = vsel %vm747_vm3, %v3602_v25, 0.0 }
 0x34c   : > { %v3604_v44 = vpop.eup %3020 }
 0x34d   : > { %v3606_v39 = vpop.eup %3022  ;;  %v1516_v15 = vsel %vm747_vm3, %v3604_v44, 0.0 }
 0x34e   : > { %v3612_v22 = vpop.eup %3024  ;;  %1517 = vadd.xlane.f32.xlu0 %v1516_v15  ;;  %1283 = vadd.xlane.f32.xlu1 %v1282_v20  ;;  %v1513_v45 = vsel %vm747_vm3, %v3606_v39, 0.0 }
 0x34f   : > { %v1519_v28 = vsel %vm747_vm3, %v3612_v22, 0.0 }
 0x350   : > { %v3618_v30 = vpop.eup %3026 }
 0x351   : > { %v1522_v34 = vsel %vm747_vm3, %v3618_v30, 0.0  ;;  %v3622_v31 = vpop.eup %3028 }
 0x352   : > { %1514 = vadd.xlane.f32.xlu1 %v1513_v45  ;;  %1520 = vadd.xlane.f32.xlu0 %v1519_v28  ;;  %v1525_v50 = vsel %vm747_vm3, %v3622_v31, 0.0 }
 0x354   : > { %v3626_v9 = vpop.eup %3030 }
 0x355   : > { %v1528_v38 = vsel %vm747_vm3, %v3626_v9, 0.0 }
 0x356   : > { %1523 = vadd.xlane.f32.xlu1 %v1522_v34 }
 0x35a   : > { %1526 = vadd.xlane.f32.xlu1 %v1525_v50 }
 0x35e   : > { %1529 = vadd.xlane.f32.xlu1 %v1528_v38 }
 0x366   : > { %v786_v40 = vpop.xlane.xlu0 %785 }
 0x367   : > { %3032 = vrcp.f32 %v786_v40 }
 0x368   : > { %1548 = vrot.lane.b32.xlu0 %v3252_v33, %s3134_s23 }
 0x36a   : > { %v789_v55 = vpop.xlane.xlu1 %788 }
 0x36b   : > { %3034 = vrcp.f32 %v789_v55 }
 0x36e   : > { %v792_v43 = vpop.xlane.xlu0 %791 }
 0x36f   : > { %1546 = vrot.lane.b32.xlu1 %v3245_v19, %s3134_s23  ;;  %3036 = vrcp.f32 %v792_v43  ;;  %s3830_s23 = scalar_lea.vmem %s3955_s6, %s2585_s20 }
 0x372   : > { %v795_v63 = vpop.xlane.xlu1 %794 }
 0x373   : > { %3038 = vrcp.f32 %v795_v63 }
 0x374   : > { %v3033_v4 = vpop.eup %3032 }
 0x375   : > { %v808_v60 = vmul.f32 %v3033_v4, %v3505_v62 }
 0x376   : > { %v798_v27 = vpop.xlane.xlu0 %797 }
 0x377   : > { %3040 = vrcp.f32 %v798_v27 }
 0x378   : > { %v3035_v35 = vpop.eup %3034 }
 0x379   : > { %v809_v11 = vmul.f32 %v3035_v35, %v3510_v5 }
 0x37a   : > { %v801_v48 = vpop.xlane.xlu1 %800 }
 0x37b   : > { %v814_v33 = vpack.c.bf16 %v809_v11, %v808_v60  ;;  %3042 = vrcp.f32 %v801_v48 }
 0x37c   : > { %v3037_v49 = vpop.eup %3036 }
 0x37d   : > { %2708 = vmatmul.mubr.msk.bf16.vlgmr.msra.gmra.mxu0 %vm747_vm3, %v814_v33  ;;  %v810_v62 = vmul.f32 %v3037_v49, %v3515_v10 }
 0x37e   : > { %2738 = vmatpush3.bf16.msra.mxu0 %v3498_v46  ;;  %v1029_v19 = vpop.xlane.xlu1 %1028  ;;  %2711 = vmatprep.mubr.msk.bf16.mxu0 %vm3123_vm0, %v3122_v0 }
 0x37f   : > { %2739 = vmatprep.subr.bf16.mxu0 %v3122_v0  ;;  %3044 = vrcp.f32 %v1029_v19 }
 0x380   : > { %v3039_v13 = vpop.eup %3038 }
 0x381   : > { %v811_v5 = vmul.f32 %v3039_v13, %v3520_v23 }
 0x382   : > { %2740 = vmatpush3.bf16.msra.mxu0 %v3303_v61  ;;  %v1032_v51 = vpop.xlane.xlu0 %1031 }
 0x383   : > { %3046 = vrcp.f32 %v1032_v51  ;;  %2741 = vmatprep.subr.bf16.mxu0 %v3122_v0  ;;  %v815_v3 = vpack.c.bf16 %v811_v5, %v810_v62 }
 0x384   : > { %v3041_v46 = vpop.eup %3040 }
 0x385   : > { %2712 = vmatmul.mubr.msk.bf16.gmra.mxu0 %vm747_vm3, %v815_v3  ;;  %v812_v61 = vmul.f32 %v3041_v46, %v3525_v36 }
 0x386   : > { %2742 = vmatpush3.bf16.msra.mxu0 %v3573_v7  ;;  %v1035_v17 = vpop.xlane.xlu1 %1034  ;;  %2715 = vmatprep.mubr.msk.bf16.mxu0 %vm3123_vm0, %v3122_v0 }
 0x387   : > { %2773 = vmatprep.subr.bf16.mxu0 %v3122_v0  ;;  %3048 = vrcp.f32 %v1035_v17 }
 0x388   : > { %v3043_v10 = vpop.eup %3042 }
 0x389   : > { %v813_v23 = vmul.f32 %v3043_v10, %v3530_v21 }
 0x38a   : > { %v1038_v53 = vpop.xlane.xlu1 %1037 }
 0x38b   : > { %3050 = vrcp.f32 %v1038_v53  ;;  %v816_v41 = vpack.c.bf16 %v813_v23, %v812_v61 }
 0x38c   : > { %v3045_v29 = vpop.eup %3044 }
 0x38d   : > { %2716 = vmatmul.mubr.msk.bf16.gmra.mxu0 %vm747_vm3, %v816_v41  ;;  %v1051_v8 = vmul.f32 %v3045_v29, %v3535_v47 }
 0x38e   : > { %v1041_v54 = vpop.xlane.xlu1 %1040  ;;  %2743 = vmatprep.mubr.msk.bf16.mxu0 %vm3123_vm0, %v3122_v0 }
 0x38f   : > { %3052 = vrcp.f32 %v1041_v54 }
 0x390   : > { %v3047_v7 = vpop.eup %3046 }
 0x391   : > { %v1052_v57 = vmul.f32 %v3047_v7, %v3540_v52 }
 0x392   : > { %v1044_v14 = vpop.xlane.xlu1 %1043 }
 0x393   : > { %v1057_v36 = vpack.c.bf16 %v1052_v57, %v1051_v8  ;;  %3054 = vrcp.f32 %v1044_v14 }
 0x394   : > { %v3049_v21 = vpop.eup %3048 }
 0x395   : > { %2744 = vmatmul.mubr.msk.bf16.vlgmr.msra.gmra.mxu0 %vm747_vm3, %v1057_v36  ;;  %v1053_v47 = vmul.f32 %v3049_v21, %v3545_v56 }
 0x396   : > { %2774 = vmatpush3.bf16.msra.mxu0 %v3569_v6  ;;  %2747 = vmatprep.mubr.msk.bf16.mxu0 %vm3123_vm0, %v3122_v0  ;;  %v1272_v42 = vpop.xlane.xlu0 %1271 }
 0x397   : > { %2775 = vmatprep.subr.bf16.mxu0 %v3122_v0  ;;  %3056 = vrcp.f32 %v1272_v42 }
 0x398   : > { %v3051_v1 = vpop.eup %3050 }
 0x399   : > { %v1054_v52 = vmul.f32 %v3051_v1, %v3549_v16 }
 0x39a   : > { %2776 = vmatpush3.bf16.msra.mxu0 %v3571_v32  ;;  %v1304_v15 = vpop.permute.xlu0 %1303  ;;  %v1551_v32 = vpop.permute.xlu1 %1550 }
 0x39b   : > { %2777 = vmatprep.subr.bf16.mxu0 %v3122_v0  ;;  %v1058_v18 = vpack.c.bf16 %v1054_v52, %v1053_v47 }
 0x39c   : > { %v3053_v6 = vpop.eup %3052 }
 0x39d   : > { %2748 = vmatmul.mubr.msk.bf16.gmra.mxu0 %vm747_vm3, %v1058_v18  ;;  %v1055_v56 = vmul.f32 %v3053_v6, %v3553_v12 }
 0x39e   : > { %2778 = vmatpush3.bf16.msra.mxu0 %v1304_v15  ;;  %2751 = vmatprep.mubr.msk.bf16.mxu0 %vm3123_vm0, %v3122_v0 }
 0x39f   : > { %2809 = vmatprep.subr.bf16.mxu0 %v3122_v0 }
 0x3a0   : > { %v3055_v20 = vpop.eup %3054 }
 0x3a1   : > { %v1056_v16 = vmul.f32 %v3055_v20, %v3557_v24 }
 0x3a3   : > { %v1059_v45 = vpack.c.bf16 %v1056_v16, %v1055_v56 }
 0x3a4   : > { %v3057_v40 = vpop.eup %3056 }
 0x3a5   : > { %2752 = vmatmul.mubr.msk.bf16.gmra.mxu0 %vm747_vm3, %v1059_v45  ;;  %v1294_v43 = vmul.f32 %v3057_v40, %v3561_v2 }
 0x3a6   : > { %2779 = vmatprep.mubr.msk.bf16.mxu0 %vm3123_vm0, %v3122_v0 }
 0x3cb   : > { %v1275_v28 = vpop.xlane.xlu1 %1274 }
 0x3cc   : > { %3058 = vrcp.f32 %v1275_v28 }
 0x3cf   : > { %v1278_v34 = vpop.xlane.xlu1 %1277 }
 0x3d0   : > { %3060 = vrcp.f32 %v1278_v34 }
 0x3d3   : > { %v1281_v50 = vpop.xlane.xlu1 %1280  ;;  %v1287_v38 = vpop.xlane.xlu0 %1286 }
 0x3d4   : > { %3062 = vrcp.f32 %v1281_v50 }
 0x3d7   : > { %v1284_v55 = vpop.xlane.xlu1 %1283  ;;  %v1518_v12 = vpop.xlane.xlu0 %1517 }
 0x3d8   : > { %3064 = vrcp.f32 %v1284_v55 }
 0x3d9   : > { %v3059_v24 = vpop.eup %3058  ;;  %3066 = vrcp.f32 %v1287_v38 }
 0x3da   : > { %v1295_v63 = vmul.f32 %v3059_v24, %v3584_v26  ;;  %v2974_v24 = vld [vmem:[%s496_s27 + $0x8] sm:$0xff]  }
 0x3db   : > { %v1515_v4 = vpop.xlane.xlu1 %1514  ;;  %v1521_v35 = vpop.xlane.xlu0 %1520  ;;  %2828 = vmatpush3.bf16.msra.mxu1 %v2974_v24 }
 0x3dc   : > { %v1300_v27 = vpack.c.bf16 %v1295_v63, %v1294_v43  ;;  %3068 = vrcp.f32 %v1515_v4  ;;  %2829 = vmatprep.subr.bf16.mxu1 %v3122_v0 }
 0x3dd   : > { %v3061_v60 = vpop.eup %3060  ;;  %3070 = vrcp.f32 %v1518_v12 }
 0x3de   : > { %2780 = vmatmul.mubr.msk.bf16.vlgmr.msra.gmra.mxu0 %vm747_vm3, %v1300_v27  ;;  %v1296_v26 = vmul.f32 %v3061_v60, %v3589_v37 }
 0x3df   : > { %2810 = vmatpush3.bf16.msra.mxu0 %v1551_v32  ;;  %v1524_v11 = vpop.xlane.xlu1 %1523  ;;  %2783 = vmatprep.mubr.msk.bf16.mxu0 %vm3123_vm0, %v3122_v0  ;;  %v1549_v2 = vpop.permute.xlu0 %1548 }
 0x3e0   : > { %2811 = vmatprep.subr.bf16.mxu0 %v3122_v0  ;;  %3072 = vrcp.f32 %v1524_v11 }
 0x3e1   : > { %v3063_v48 = vpop.eup %3062  ;;  %3074 = vrcp.f32 %v1521_v35 }
 0x3e2   : > { %v1297_v33 = vmul.f32 %v3063_v48, %v3594_v58 }
 0x3e3   : > { %2812 = vmatpush3.bf16.msra.mxu0 %v1549_v2  ;;  %v1527_v49 = vpop.xlane.xlu1 %1526 }
 0x3e4   : > { %v1301_v19 = vpack.c.bf16 %v1297_v33, %v1296_v26  ;;  %2813 = vmatprep.subr.bf16.mxu0 %v3122_v0 }
 0x3e5   : > { %v3065_v13 = vpop.eup %3064 }
 0x3e6   : > { %2784 = vmatmul.mubr.msk.bf16.gmra.mxu0 %vm747_vm3, %v1301_v19  ;;  %v3067_v62 = vpop.eup %3066  ;;  %v1298_v51 = vmul.f32 %v3065_v13, %v3602_v25 }
 0x3e7   : > { %v1530_v5 = vpop.xlane.xlu1 %1529  ;;  %2787 = vmatprep.mubr.msk.bf16.mxu0 %vm3123_vm0, %v3122_v0  ;;  %v1299_v37 = vmul.f32 %v3067_v62, %v3596_v59 }
 0x3e8   : > { %3076 = vrcp.f32 %v1530_v5 }
 0x3e9   : > { %v1302_v3 = vpack.c.bf16 %v1299_v37, %v1298_v51  ;;  %v3069_v46 = vpop.eup %3068  ;;  %3078 = vrcp.f32 %v1527_v49  ;;  %v2975_v49 = vld [vmem:[%s496_s27] sm:$0xff]  }
 0x3ea   : > { %v3071_v17 = vpop.eup %3070  ;;  %v1537_v10 = vmul.f32 %v3069_v46, %v3606_v39  ;;  %2830 = vmatpush3.bf16.msra.mxu1 %v2975_v49 }
 0x3eb   : > { %v1547_v58 = vpop.permute.xlu1 %1546  ;;  %v1538_v25 = vmul.f32 %v3071_v17, %v3604_v44  ;;  %2859 = vmatprep.subr.bf16.mxu1 %v3122_v0 }
 0x3ec   : > { %2814 = vmatpush3.bf16.msra.mxu0 %v1547_v58 }
 0x3ed   : > { %2843 = vmatprep.subr.bf16.mxu0 %v3122_v0  ;;  %v1543_v61 = vpack.c.bf16 %v1538_v25, %v1537_v10  ;;  %v3073_v59 = vpop.eup %3072 }
 0x3ee   : > { %2788 = vmatmul.mubr.msk.bf16.gmra.mxu0 %vm747_vm3, %v1302_v3  ;;  %v3075_v23 = vpop.eup %3074  ;;  %v1540_v53 = vmul.f32 %v3073_v59, %v3618_v30 }
 0x3ef   : > { %2815 = vmatprep.mubr.msk.bf16.mxu0 %vm3123_vm0, %v3122_v0  ;;  %v1539_v41 = vmul.f32 %v3075_v23, %v3612_v22 }
 0x3f1   : > { %v1544_v29 = vpack.c.bf16 %v1540_v53, %v1539_v41 }
 0x3f5   : > { %v3077_v54 = vpop.eup %3076 }
 0x3f6   : > { %2816 = vmatmul.mubr.msk.bf16.vlgmr.msra.gmra.mxu0 %vm747_vm3, %v1543_v61  ;;  %v3079_v39 = vpop.eup %3078  ;;  %v1542_v44 = vmul.f32 %v3077_v54, %v3626_v9 }
 0x3f7   : > { %2819 = vmatprep.mubr.msk.bf16.mxu0 %vm3123_vm0, %v3122_v0  ;;  %v1541_v7 = vmul.f32 %v3079_v39, %v3622_v31 }
 0x3f9   : > { %v1545_v8 = vpack.c.bf16 %v1542_v44, %v1541_v7 }
 0x3fe   : > { %2820 = vmatmul.mubr.msk.bf16.gmra.mxu0 %vm747_vm3, %v1544_v29 }
 0x3ff   : > { %2823 = vmatprep.mubr.msk.bf16.mxu0 %vm3123_vm0, %v3122_v0 }
 0x406   : > { %2824 = vmatmul.mubr.msk.bf16.gmra.mxu0 %vm747_vm3, %v1545_v8 }
 0x407   : > { %2847 = vmatprep.mubr.msk.bf16.mxu0 %vm3123_vm0, %v3122_v0 }
 0x43d   : > { %v3708_v30 = vpop.f32.mrf.mxu0 }
 0x43f   : > { %v2709_v22 = vpop.f32.mrf.mxu0 }
 0x441   : > { %v3710_v57 = vpop.f32.mrf.mxu0 }
 0x443   : > { %v2710_v14 = vpop.f32.mrf.mxu0 }
 0x445   : > { %v3712_v36 = vpop.f32.mrf.mxu0 }
 0x447   : > { %v2713_v21 = vpop.f32.mrf.mxu0 }
 0x449   : > { %v3714_v42 = vpop.f32.mrf.mxu0 }
 0x44b   : > { %v2714_v9 = vpop.f32.mrf.mxu0 }
 0x44d   : > { %v3716_v1 = vpop.f32.mrf.mxu0 }
 0x44f   : > { %v2717_v31 = vpop.f32.mrf.mxu0 }
 0x451   : > { %v3718_v47 = vpop.f32.mrf.mxu0 }
 0x453   : > { %v2718_v52 = vpop.f32.mrf.mxu0 }
 0x455   : > { %v1112_v18 = vpop.f32.mrf.mxu0 }
 0x457   : > { %v2745_v15 = vpop.f32.mrf.mxu0 }
 0x459   : > { %v1115_v6 = vpop.f32.mrf.mxu0 }
 0x45a   : > { %v2927_v20 = vpack.i.bf16 %v1115_v6, %v1112_v18 }
 0x45b   : > { %v2746_v56 = vpop.f32.mrf.mxu0 }
 0x45c   : > { %2928 = vrot.lane.b32.xlu1 %v2927_v20, %s3135_s24 }
 0x45d   : > { %v1120_v16 = vpop.f32.mrf.mxu0 }
 0x45f   : > { %v2749_v45 = vpop.f32.mrf.mxu0 }
 0x461   : > { %v1123_v32 = vpop.f32.mrf.mxu0 }
 0x462   : > { %v2942_v28 = vpack.i.bf16 %v1123_v32, %v1120_v16 }
 0x463   : > { %v2750_v34 = vpop.f32.mrf.mxu0 }
 0x465   : > { %v1128_v50 = vpop.f32.mrf.mxu0 }
 0x467   : > { %v2753_v38 = vpop.f32.mrf.mxu0 }
 0x469   : > { %v1131_v40 = vpop.f32.mrf.mxu0 }
 0x46a   : > { %v2957_v55 = vpack.i.bf16 %v1131_v40, %v1128_v50 }
 0x46b   : > { %v2754_v12 = vpop.f32.mrf.mxu0 }
 0x49e   : > { %v1355_v43 = vpop.f32.mrf.mxu0 }
 0x4a0   : > { %v2781_v63 = vpop.f32.mrf.mxu0 }
 0x4a2   : > { %v1358_v4 = vpop.f32.mrf.mxu0 }
 0x4a3   : > { %v2932_v27 = vpack.i.bf16 %v1358_v4, %v1355_v43 }
 0x4a4   : > { %v2782_v35 = vpop.f32.mrf.mxu0 }
 0x4a5   : > { %2933 = vrot.lane.b32.xlu1 %v2932_v27, %s3136_s28 }
 0x4a6   : > { %v1363_v60 = vpop.f32.mrf.mxu0 }
 0x4a8   : > { %v2785_v11 = vpop.f32.mrf.mxu0 }
 0x4aa   : > { %v1366_v48 = vpop.f32.mrf.mxu0 }
 0x4ab   : > { %v2947_v10 = vpack.i.bf16 %v1366_v48, %v1363_v60 }
 0x4ac   : > { %v2786_v2 = vpop.f32.mrf.mxu0 }
 0x4ae   : > { %v1371_v26 = vpop.f32.mrf.mxu0 }
 0x4b0   : > { %v2789_v33 = vpop.f32.mrf.mxu0 }
 0x4b2   : > { %v1374_v19 = vpop.f32.mrf.mxu0 }
 0x4b3   : > { %v2962_v23 = vpack.i.bf16 %v1374_v19, %v1371_v26 }
 0x4b4   : > { %v2790_v13 = vpop.f32.mrf.mxu0 }
 0x4b6   : > { %v1598_v62 = vpop.f32.mrf.mxu0 }
 0x4b8   : > { %v2817_v5 = vpop.f32.mrf.mxu0 }
 0x4ba   : > { %v1601_v51 = vpop.f32.mrf.mxu0 }
 0x4bb   : > { %v2937_v37 = vpack.i.bf16 %v1601_v51, %v1598_v62 }
 0x4bc   : > { %v2818_v58 = vpop.f32.mrf.mxu0 }
 0x4bd   : > { %2938 = vrot.lane.b32.xlu1 %v2937_v37, %s3137_s29 }
 0x4be   : > { %v1606_v3 = vpop.f32.mrf.mxu0 }
 0x4c0   : > { %v2821_v46 = vpop.f32.mrf.mxu0 }
 0x4c1   : > { %2943 = vrot.lane.b32.xlu1 %v2942_v28, %s3135_s24 }
 0x4c2   : > { %v1609_v17 = vpop.f32.mrf.mxu0 }
 0x4c3   : > { %v2952_v25 = vpack.i.bf16 %v1609_v17, %v1606_v3  ;;  %v3775_v3 = vld [vmem:[%s510_s17] sm:$0x3f] }
 0x4c4   : > { %v2822_v61 = vpop.f32.mrf.mxu0 }
 0x4c5   : > { %2948 = vrot.lane.b32.xlu1 %v2947_v10, %s3136_s28  ;;  %2953 = vrot.lane.b32.xlu0 %v2952_v25, %s3137_s29  ;;  %v3108_v61 = vld [vmem:[%s3222_s22] sm:$0xff] }
 0x4c6   : > { %v1614_v59 = vpop.f32.mrf.mxu0 }
 0x4c8   : > { %v2825_v53 = vpop.f32.mrf.mxu0 }
 0x4c9   : > { %2958 = vrot.lane.b32.xlu1 %v2957_v55, %s3135_s24  ;;  %2963 = vrot.lane.b32.xlu0 %v2962_v23, %s3136_s28 }
 0x4ca   : > { %v1617_v41 = vpop.f32.mrf.mxu0 }
 0x4cb   : > { %v2967_v29 = vpack.i.bf16 %v1617_v41, %v1614_v59 }
 0x4cc   : > { %v2826_v54 = vpop.f32.mrf.mxu0 }
 0x4cd   : > { %2968 = vrot.lane.b32.xlu1 %v2967_v29, %s3137_s29  ;;  %v3109_v54 = vld [vmem:[%s3222_s22 + $0x8] sm:$0xff]  ;;  %s518_s29 = scalar_lea.vmem %s3958_s9, %s3210_s15 }
 0x4ce   : > { %v2929_v39 = vpop.permute.xlu1 %2928 }
 0x4cf   : > { %v2931_v7 = vunpack.i.h.bf16 %v2929_v39  ;;  %v2930_v8 = vunpack.i.l.bf16 %v2929_v39 }
 0x4d1   : > { %v1694_v9 = vsel %vm659_vm2, %v3710_v57, %v2931_v7  ;;  %v1693_v31 = vsel %vm659_vm2, %v3708_v30, %v2930_v8 }
 0x517   : > { %v2934_v44 = vpop.permute.xlu1 %2933 }
 0x518   : > { %v2936_v22 = vunpack.i.h.bf16 %v2934_v44  ;;  %v2935_v14 = vunpack.i.l.bf16 %v2934_v44 }
 0x51a   : > { %v1701_v15 = vsel %vm1699_vm4, %v1694_v9, %v2936_v22  ;;  %v1700_v6 = vsel %vm1699_vm4, %v1693_v31, %v2935_v14  ;;  %v3110_v14 = vld [vmem:[%s3222_s22 + $0x10] sm:$0xff] }
 0x52f   : > { %v2939_v21 = vpop.permute.xlu1 %2938 }
 0x530   : > { %v2941_v52 = vunpack.i.h.bf16 %v2939_v21  ;;  %v2940_v18 = vunpack.i.l.bf16 %v2939_v21 }
 0x532   : > { %v1708_v20 = vsel %vm1706_vm5, %v1701_v15, %v2941_v52  ;;  %v1707_v56 = vsel %vm1706_vm5, %v1700_v6, %v2940_v18  ;;  %v3111_v15 = vld [vmem:[%s3222_s22 + $0x18] sm:$0xff] }
 0x533   : > { %v1713_v16 = vpack.c.bf16 %v1708_v20, %v1707_v56  ;;  %v2944_v45 = vpop.permute.xlu1 %2943 }
 0x534   : > { %v2946_v32 = vunpack.i.h.bf16 %v2944_v45  ;;  %v2945_v28 = vunpack.i.l.bf16 %v2944_v45 }
 0x535   : > { %2832 = vmatmul.mubr.msk.bf16.vlgmr.msra.gmra.mxu1 %vm580_vm1, %v1713_v16 }
 0x536   : > { %2835 = vmatprep.mubr.msk.bf16.mxu1 %vm3123_vm0, %v3122_v0  ;;  %v1696_v55 = vsel %vm659_vm2, %v3714_v42, %v2946_v32  ;;  %v1695_v12 = vsel %vm659_vm2, %v3712_v36, %v2945_v28  ;;  %v3112_v32 = vld [vmem:[%s3222_s22 + $0x20] sm:$0xff] }
 0x537   : > { %v2949_v30 = vpop.permute.xlu1 %2948  ;;  %v2954_v57 = vpop.permute.xlu0 %2953 }
 0x538   : > { %v2951_v34 = vunpack.i.h.bf16 %v2949_v30  ;;  %v2950_v50 = vunpack.i.l.bf16 %v2949_v30  ;;  %v2956_v38 = vunpack.i.h.bf16 %v2954_v57  ;;  %v2955_v40 = vunpack.i.l.bf16 %v2954_v57 }
 0x53a   : > { %v1702_v24 = vsel %vm1699_vm4, %v1695_v12, %v2950_v50  ;;  %v1703_v43 = vsel %vm1699_vm4, %v1696_v55, %v2951_v34 }
 0x53b   : > { %v1710_v63 = vsel %vm1706_vm5, %v1703_v43, %v2956_v38  ;;  %v1709_v4 = vsel %vm1706_vm5, %v1702_v24, %v2955_v40  ;;  %v2959_v27 = vpop.permute.xlu1 %2958  ;;  %v2964_v35 = vpop.permute.xlu0 %2963  ;;  %v3113_v38 = vld [vmem:[%s3222_s22 + $0x28] sm:$0xff] }
 0x53c   : > { %v1714_v60 = vpack.c.bf16 %v1710_v63, %v1709_v4  ;;  %v2961_v11 = vunpack.i.h.bf16 %v2959_v27  ;;  %v2960_v48 = vunpack.i.l.bf16 %v2959_v27  ;;  %v2966_v2 = vunpack.i.h.bf16 %v2964_v35 }
 0x53d   : > { %v2965_v26 = vunpack.i.l.bf16 %v2964_v35 }
 0x53e   : > { %v1698_v42 = vsel %vm659_vm2, %v3718_v47, %v2961_v11  ;;  %v1697_v36 = vsel %vm659_vm2, %v3716_v1, %v2960_v48  ;;  %2836 = vmatmul.mubr.msk.bf16.gmra.mxu1 %vm580_vm1, %v1714_v60  ;;  %v1716_v1 = vlaneseq }
 0x53f   : > { %v2969_v33 = vpop.permute.xlu1 %2968  ;;  %2839 = vmatprep.mubr.msk.bf16.mxu1 %vm3123_vm0, %v3122_v0  ;;  %v1705_v13 = vsel %vm1699_vm4, %v1698_v42, %v2966_v2  ;;  %v1704_v62 = vsel %vm1699_vm4, %v1697_v36, %v2965_v26 }
 0x540   : > { %v2971_v49 = vunpack.i.h.bf16 %v2969_v33  ;;  %v2970_v19 = vunpack.i.l.bf16 %v2969_v33  ;;  %v3767_v37 = vshrl.u32 %v1716_v1, 7 }
 0x542   : > { %v1712_v5 = vsel %vm1706_vm5, %v1705_v13, %v2971_v49  ;;  %v1711_v47 = vsel %vm1706_vm5, %v1704_v62, %v2970_v19  ;;  %v1718_v58 = vsub.s32 0, %v3767_v37 }
 0x543   : > { %v1715_v51 = vpack.c.bf16 %v1712_v5, %v1711_v47 }
 0x544   : > { %v1719_v46 = vrot.slane %v3775_v3, %v1718_v58 }
 0x546   : > { %2840 = vmatmul.mubr.msk.bf16.gmra.mxu1 %vm580_vm1, %v1715_v51 }
 0x547   : > { %2867 = vmatprep.mubr.msk.bf16.mxu1 %vm3123_vm0, %v3122_v0 }
 0x5f5   : > { %v1775_v17 = vpop.f32.mrf.mxu1 }
 0x5f6   : > { %v1776_v10 = vadd.f32 %v1775_v17, %v1719_v46 }
 0x5f7   : > { %v2833_v25 = vpop.f32.mrf.mxu1 }
 0x5f8   : > { %v1798_v59 = vadd.f32 %v3108_v61, %v1776_v10 }
 0x5f9   : > { %v1778_v23 = vpop.f32.mrf.mxu1 }
 0x5fa   : > { %v1779_v53 = vadd.f32 %v1778_v23, %v1719_v46  ;;  %v1804_v41 = vsel %vm580_vm1, %v1798_v59, 0.0 }
 0x5fb   : > { %v2834_v29 = vpop.f32.mrf.mxu1  ;;  %1805 = vadd.xlane.f32.xlu0 %v1804_v41  ;;  %v2977_v41 = vld [vmem:[%s501_s19] sm:$0xff]  }
 0x5fc   : > { %v1799_v39 = vadd.f32 %v3109_v54, %v1779_v53  ;;  %v2976_v53 = vld [vmem:[%s501_s19 + $0x8] sm:$0xff]   ;;  %v2978_v29 = vld [vmem:[%s3830_s23 + $0x18] sm:$0xff]  }
 0x5fd   : > { %2844 = vmatpush3.bf16.msra.mxu0 %v2976_v53  ;;  %2860 = vmatpush3.bf16.msra.mxu1 %v2978_v29 }
 0x5fe   : > { %v1783_v44 = vpop.f32.mrf.mxu1  ;;  %v1807_v7 = vsel %vm580_vm1, %v1799_v39, 0.0  ;;  %2845 = vmatprep.subr.bf16.mxu0 %v3122_v0  ;;  %2861 = vmatprep.subr.bf16.mxu1 %v3122_v0 }
 0x5ff   : > { %v1784_v8 = vadd.f32 %v1783_v44, %v1719_v46  ;;  %1808 = vadd.xlane.f32.xlu1 %v1807_v7 }
 0x600   : > { %v2837_v22 = vpop.f32.mrf.mxu1 }
 0x601   : > { %v1800_v21 = vadd.f32 %v3110_v14, %v1784_v8  ;;  %2846 = vmatpush3.bf16.msra.mxu0 %v2977_v41 }
 0x602   : > { %v1786_v9 = vpop.f32.mrf.mxu1  ;;  %2879 = vmatprep.subr.mxu0 %v3122_v0 }
 0x603   : > { %v1787_v31 = vadd.f32 %v1786_v9, %v1719_v46  ;;  %v1810_v52 = vsel %vm580_vm1, %v1800_v21, 0.0 }
 0x604   : > { %1811 = vadd.xlane.f32.xlu0 %v1810_v52  ;;  %v2838_v18 = vpop.f32.mrf.mxu1 }
 0x605   : > { %v1801_v6 = vadd.f32 %v3111_v15, %v1787_v31  ;;  %v1885_v18 = vsub.s32 1, %v3767_v37 }
 0x606   : > { %v1791_v20 = vpop.f32.mrf.mxu1 }
 0x607   : > { %v1792_v56 = vadd.f32 %v1791_v20, %v1719_v46  ;;  %v1813_v16 = vsel %vm580_vm1, %v1801_v6, 0.0 }
 0x608   : > { %1814 = vadd.xlane.f32.xlu0 %v1813_v16  ;;  %v2841_v45 = vpop.f32.mrf.mxu1  ;;  %v1895_v16 = vsub.s32 2, %v3767_v37 }
 0x609   : > { %v1802_v28 = vadd.f32 %v3112_v32, %v1792_v56  ;;  %v1886_v45 = vrot.slane %v3775_v3, %v1885_v18 }
 0x60a   : > { %v1794_v30 = vpop.f32.mrf.mxu1 }
 0x60b   : > { %v1795_v57 = vadd.f32 %v1794_v30, %v1719_v46  ;;  %v1816_v34 = vsel %vm580_vm1, %v1802_v28, 0.0 }
 0x60c   : > { %1817 = vadd.xlane.f32.xlu0 %v1816_v34  ;;  %v2842_v50 = vpop.f32.mrf.mxu1 }
 0x60d   : > { %v1803_v40 = vadd.f32 %v3113_v38, %v1795_v57  ;;  %v1896_v50 = vrot.slane %v3775_v3, %v1895_v16 }
 0x60f   : > { %v1819_v55 = vsel %vm580_vm1, %v1803_v40, 0.0 }
 0x610   : > { %1820 = vadd.xlane.f32.xlu1 %v1819_v55 }
 0x684   : > { %v1806_v12 = vpop.xlane.xlu0 %1805 }
 0x685   : > { %v1823_v24 = vmul.f32 0.03125, %v1806_v12 }
 0x687   : > { %v3790_v43 = vsub.f32 %v1798_v59, %v1823_v24 }
 0x688   : > { %v1809_v63 = vpop.xlane.xlu1 %1808 }
 0x689   : > { %v1824_v4 = vmul.f32 0.03125, %v1809_v63  ;;  %v1835_v27 = vmul.f32 %v3790_v43, %v3790_v43 }
 0x68b   : > { %v3794_v35 = vsub.f32 %v1799_v39, %v1824_v4  ;;  %v1841_v60 = vsel %vm580_vm1, %v1835_v27, 0.0 }
 0x68c   : > { %1842 = vadd.xlane.f32.xlu0 %v1841_v60 }
 0x68d   : > { %v1812_v11 = vpop.xlane.xlu0 %1811  ;;  %v1836_v48 = vmul.f32 %v3794_v35, %v3794_v35 }
 0x68e   : > { %v1825_v2 = vmul.f32 0.03125, %v1812_v11 }
 0x68f   : > { %v1844_v26 = vsel %vm580_vm1, %v1836_v48, 0.0 }
 0x690   : > { %v3800_v42 = vsub.f32 %v1800_v21, %v1825_v2  ;;  %1845 = vadd.xlane.f32.xlu1 %v1844_v26 }
 0x691   : > { %v1815_v36 = vpop.xlane.xlu0 %1814 }
 0x692   : > { %v1826_v33 = vmul.f32 0.03125, %v1815_v36  ;;  %v1837_v49 = vmul.f32 %v3800_v42, %v3800_v42 }
 0x694   : > { %v3804_v19 = vsub.f32 %v1801_v6, %v1826_v33  ;;  %v1847_v13 = vsel %vm580_vm1, %v1837_v49, 0.0 }
 0x695   : > { %1848 = vadd.xlane.f32.xlu0 %v1847_v13  ;;  %v1818_v62 = vpop.xlane.xlu0 %1817 }
 0x696   : > { %v1827_v5 = vmul.f32 0.03125, %v1818_v62  ;;  %v1838_v47 = vmul.f32 %v3804_v19, %v3804_v19 }
 0x698   : > { %v3809_v51 = vsub.f32 %v1802_v28, %v1827_v5  ;;  %v1850_v58 = vsel %vm580_vm1, %v1838_v47, 0.0 }
 0x699   : > { %1851 = vadd.xlane.f32.xlu1 %v1850_v58  ;;  %v1821_v46 = vpop.xlane.xlu1 %1820  ;;  %v2979_v58 = vld [vmem:[%s3830_s23 + $0x10] sm:$0xff]  }
 0x69a   : > { %v1828_v17 = vmul.f32 0.03125, %v1821_v46  ;;  %v1839_v10 = vmul.f32 %v3809_v51, %v3809_v51  ;;  %2862 = vmatpush3.bf16.msra.mxu1 %v2979_v58  ;;  %v2980_v46 = vld [vmem:[%s3830_s23 + $0x8] sm:$0xff]  }
 0x69b   : > { %2863 = vmatprep.subr.bf16.mxu1 %v3122_v0 }
 0x69c   : > { %v3814_v25 = vsub.f32 %v1803_v40, %v1828_v17  ;;  %v1853_v61 = vsel %vm580_vm1, %v1839_v10, 0.0  ;;  %v2981_v17 = vld [vmem:[%s3830_s23] sm:$0xff]  }
 0x69d   : > { %1854 = vadd.xlane.f32.xlu0 %v1853_v61  ;;  %v2562_v10 = vld [vmem:[%s513_s26] ss:$0 sm:$0xff] }
 0x69e   : > { %v1840_v59 = vmul.f32 %v3814_v25, %v3814_v25  ;;  %2864 = vmatpush3.bf16.msra.mxu1 %v2980_v46 }
 0x69f   : > { %2865 = vmatprep.subr.bf16.mxu1 %v3122_v0 }
 0x6a0   : > { %v1856_v23 = vsel %vm580_vm1, %v1840_v59, 0.0 }
 0x6a1   : > { %1857 = vadd.xlane.f32.xlu1 %v1856_v23 }
 0x6a2   : > { %2866 = vmatpush3.bf16.msra.mxu1 %v2981_v17 }
 0x715   : > { %v1843_v54 = vpop.xlane.xlu0 %1842 }
 0x716   : > { %v1859_v39 = vmul.f32 0.03125, %v1843_v54 }
 0x718   : > { %v1865_v44 = vadd.f32 1e-05, %v1859_v39 }
 0x719   : > { %v1846_v7 = vpop.xlane.xlu1 %1845 }
 0x71a   : > { %3080 = vrsqrt.f32 %v1865_v44  ;;  %v1860_v8 = vmul.f32 0.03125, %v1846_v7 }
 0x71c   : > { %v1866_v22 = vadd.f32 1e-05, %v1860_v8 }
 0x71e   : > { %3082 = vrsqrt.f32 %v1866_v22  ;;  %v1849_v14 = vpop.xlane.xlu0 %1848 }
 0x71f   : > { %v1861_v21 = vmul.f32 0.03125, %v1849_v14 }
 0x721   : > { %v1867_v9 = vadd.f32 1e-05, %v1861_v21 }
 0x722   : > { %v1852_v31 = vpop.xlane.xlu1 %1851 }
 0x723   : > { %3084 = vrsqrt.f32 %v1867_v9  ;;  %v1862_v52 = vmul.f32 0.03125, %v1852_v31 }
 0x725   : > { %v1868_v15 = vadd.f32 1e-05, %v1862_v52 }
 0x726   : > { %v1855_v6 = vpop.xlane.xlu0 %1854 }
 0x727   : > { %v3081_v20 = vpop.eup %3080  ;;  %3086 = vrsqrt.f32 %v1868_v15  ;;  %v1863_v56 = vmul.f32 0.03125, %v1855_v6 }
 0x728   : > { %v1877_v32 = vmul.f32 %v3081_v20, %v3790_v43 }
 0x729   : > { %v1869_v28 = vadd.f32 1e-05, %v1863_v56 }
 0x72a   : > { %v1858_v30 = vpop.xlane.xlu1 %1857  ;;  %v1887_v38 = vmul.f32 %v1886_v45, %v1877_v32 }
 0x72b   : > { %v3083_v57 = vpop.eup %3082  ;;  %3088 = vrsqrt.f32 %v1869_v28  ;;  %v1864_v34 = vmul.f32 0.03125, %v1858_v30 }
 0x72c   : > { %v1878_v40 = vmul.f32 %v3083_v57, %v3794_v35  ;;  %v3840_v63 = vadd.f32 %v1896_v50, %v1887_v38 }
 0x72d   : > { %v1870_v55 = vadd.f32 1e-05, %v1864_v34 }
 0x72e   : > { %v1888_v12 = vmul.f32 %v1886_v45, %v1878_v40 }
 0x72f   : > { %3090 = vrsqrt.f32 %v1870_v55  ;;  %v2001_v55 = vsub.s32 3, %v3767_v37 }
 0x730   : > { %v3085_v24 = vpop.eup %3084  ;;  %v3842_v4 = vadd.f32 %v1896_v50, %v1888_v12 }
 0x731   : > { %v1879_v43 = vmul.f32 %v3085_v24, %v3800_v42 }
 0x732   : > { %v1903_v27 = vpack.c.bf16 %v3842_v4, %v3840_v63 }
 0x733   : > { %v1889_v11 = vmul.f32 %v1886_v45, %v1879_v43  ;;  %v2002_v43 = vrot.slane %v3775_v3, %v2001_v55 }
 0x734   : > { %v3087_v60 = vpop.eup %3086  ;;  %2848 = vmatmul.mubr.msk.bf16.vlgmr.msra.gmra.mxu0 %vm580_vm1, %v1903_v27 }
 0x735   : > { %2851 = vmatprep.mubr.msk.bf16.mxu0 %vm3123_vm0, %v3122_v0  ;;  %v1880_v35 = vmul.f32 %v3087_v60, %v3804_v19  ;;  %v3851_v26 = vadd.f32 %v1896_v50, %v1889_v11 }
 0x737   : > { %v1890_v48 = vmul.f32 %v1886_v45, %v1880_v35 }
 0x738   : > { %v3089_v2 = vpop.eup %3088 }
 0x739   : > { %v3853_v36 = vadd.f32 %v1896_v50, %v1890_v48  ;;  %v1881_v42 = vmul.f32 %v3089_v2, %v3809_v51 }
 0x73b   : > { %v1904_v33 = vpack.c.bf16 %v3853_v36, %v3851_v26  ;;  %v1891_v13 = vmul.f32 %v1886_v45, %v1881_v42 }
 0x73c   : > { %v3091_v49 = vpop.eup %3090 }
 0x73d   : > { %2852 = vmatmul.mubr.msk.bf16.gmra.mxu0 %vm580_vm1, %v1904_v33  ;;  %v1882_v19 = vmul.f32 %v3091_v49, %v3814_v25  ;;  %v1901_v5 = vadd.f32 %v1896_v50, %v1891_v13 }
 0x73e   : > { %2855 = vmatprep.mubr.msk.bf16.mxu0 %vm3123_vm0, %v3122_v0 }
 0x73f   : > { %v1892_v62 = vmul.f32 %v1886_v45, %v1882_v19 }
 0x741   : > { %v3862_v47 = vadd.f32 %v1896_v50, %v1892_v62 }
 0x743   : > { %v1905_v51 = vpack.c.bf16 %v3862_v47, %v1901_v5 }
 0x745   : > { %2856 = vmatmul.mubr.msk.bf16.gmra.mxu0 %vm580_vm1, %v1905_v51 }
 0x746   : > { %2891 = vmatprep.mubr.msk.f32.mxu0 %vm3123_vm0, %v3122_v0 }
 0x7f4   : > { %v1967_v25 = vpop.f32.mrf.mxu0 }
 0x7f5   : > { %v1968_v59 = vadd.f32 %v2562_v10, %v1967_v25 }
 0x7f6   : > { %v2849_v61 = vpop.f32.mrf.mxu0 }
 0x7f7   : > { %v1990_v29 = vmax.f32 %v1968_v59, 0.0 }
 0x7f8   : > { %v1970_v23 = vpop.f32.mrf.mxu0 }
 0x7f9   : > { %v1971_v53 = vadd.f32 %v2562_v10, %v1970_v23 }
 0x7fa   : > { %v2850_v41 = vpop.f32.mrf.mxu0 }
 0x7fb   : > { %v1991_v54 = vmax.f32 %v1971_v53, 0.0 }
 0x7fd   : > { %v1996_v39 = vpack.c.bf16 %v1991_v54, %v1990_v29  ;;  %v1975_v44 = vpop.f32.mrf.mxu0 }
 0x7fe   : > { %v1976_v8 = vadd.f32 %v2562_v10, %v1975_v44 }
 0x7ff   : > { %v2853_v7 = vpop.f32.mrf.mxu0  ;;  %2868 = vmatmul.mubr.msk.bf16.vlgmr.msra.gmra.mxu1 %vm2027_vm6, %v1996_v39 }
 0x800   : > { %2871 = vmatprep.mubr.msk.bf16.mxu1 %vm3123_vm0, %v3122_v0  ;;  %v1992_v9 = vmax.f32 %v1976_v8, 0.0 }
 0x801   : > { %v1978_v22 = vpop.f32.mrf.mxu0 }
 0x802   : > { %v1979_v14 = vadd.f32 %v2562_v10, %v1978_v22 }
 0x803   : > { %v2854_v21 = vpop.f32.mrf.mxu0 }
 0x804   : > { %v1993_v31 = vmax.f32 %v1979_v14, 0.0 }
 0x805   : > { %v1983_v52 = vpop.f32.mrf.mxu0 }
 0x806   : > { %v1997_v18 = vpack.c.bf16 %v1993_v31, %v1992_v9  ;;  %v1984_v6 = vadd.f32 %v2562_v10, %v1983_v52 }
 0x807   : > { %v2857_v15 = vpop.f32.mrf.mxu0 }
 0x808   : > { %2872 = vmatmul.mubr.msk.bf16.gmra.mxu1 %vm2027_vm6, %v1997_v18  ;;  %v1994_v45 = vmax.f32 %v1984_v6, 0.0 }
 0x809   : > { %v1986_v20 = vpop.f32.mrf.mxu0  ;;  %2875 = vmatprep.mubr.msk.bf16.mxu1 %vm3123_vm0, %v3122_v0 }
 0x80a   : > { %v1987_v56 = vadd.f32 %v2562_v10, %v1986_v20 }
 0x80b   : > { %v2858_v16 = vpop.f32.mrf.mxu0 }
 0x80c   : > { %v1995_v32 = vmax.f32 %v1987_v56, 0.0 }
 0x80e   : > { %v1998_v28 = vpack.c.bf16 %v1995_v32, %v1994_v45 }
 0x810   : > { %2876 = vmatmul.mubr.msk.bf16.gmra.mxu1 %vm2027_vm6, %v1998_v28 }
 0x8bf   : > { %v2071_v30 = vpop.f32.mrf.mxu1 }
 0x8c0   : > { %v2072_v2 = vadd.f32 %v2071_v30, %v2002_v43 }
 0x8c1   : > { %v2869_v57 = vpop.f32.mrf.mxu1 }
 0x8c2   : > { %v2094_v58 = vadd.f32 %v2072_v2, %v3840_v63 }
 0x8c3   : > { %v2074_v34 = vpop.f32.mrf.mxu1 }
 0x8c4   : > { %v2075_v46 = vadd.f32 %v2074_v34, %v2002_v43 }
 0x8c5   : > { %v2870_v50 = vpop.f32.mrf.mxu1 }
 0x8c6   : > { %v2095_v61 = vadd.f32 %v2075_v46, %v3842_v4  ;;  %v2190_v46 = vsub.s32 5, %v3767_v37 }
 0x8c8   : > { %v2079_v38 = vpop.f32.mrf.mxu1 }
 0x8c9   : > { %v2080_v60 = vadd.f32 %v2079_v38, %v2002_v43 }
 0x8ca   : > { %v2873_v40 = vpop.f32.mrf.mxu1 }
 0x8cb   : > { %v2096_v33 = vadd.f32 %v2080_v60, %v3851_v26  ;;  %v2100_v26 = vsel %vm580_vm1, %v2094_v58, 0.0 }
 0x8cc   : > { %v2082_v12 = vpop.f32.mrf.mxu1 }
 0x8cd   : > { %v2083_v49 = vadd.f32 %v2082_v12, %v2002_v43  ;;  %v2106_v17 = vsel %vm580_vm1, %v2096_v33, 0.0 }
 0x8ce   : > { %v2874_v24 = vpop.f32.mrf.mxu1 }
 0x8d0   : > { %v2087_v27 = vpop.f32.mrf.mxu1 }
 0x8d1   : > { %v2088_v35 = vadd.f32 %v2087_v27, %v2002_v43 }
 0x8d2   : > { %v2877_v11 = vpop.f32.mrf.mxu1 }
 0x8d3   : > { %v2098_v48 = vadd.f32 %v2088_v35, %v1901_v5  ;;  %v2097_v5 = vadd.f32 %v2083_v49, %v3853_v36 }
 0x8d4   : > { %v2090_v42 = vpop.f32.mrf.mxu1 }
 0x8d5   : > { %v2091_v19 = vadd.f32 %v2090_v42, %v2002_v43  ;;  %v2112_v13 = vsel %vm580_vm1, %v2098_v48, 0.0  ;;  %v2109_v25 = vsel %vm580_vm1, %v2097_v5, 0.0 }
 0x8d6   : > { %2113 = vadd.xlane.f32.xlu1 %v2112_v13  ;;  %v2878_v62 = vpop.f32.mrf.mxu1  ;;  %v2180_v13 = vsub.s32 4, %v3767_v37 }
 0x8d7   : > { %v2099_v51 = vadd.f32 %v2091_v19, %v3862_v47  ;;  %v2103_v47 = vsel %vm580_vm1, %v2095_v61, 0.0 }
 0x8d9   : > { %v2115_v10 = vsel %vm580_vm1, %v2099_v51, 0.0 }
 0x8da   : > { %2107 = vadd.xlane.f32.xlu1 %v2106_v17  ;;  %2116 = vadd.xlane.f32.xlu0 %v2115_v10 }
 0x8de   : > { %2101 = vadd.xlane.f32.xlu1 %v2100_v26  ;;  %2110 = vadd.xlane.f32.xlu0 %v2109_v25 }
 0x8e2   : > { %2104 = vadd.xlane.f32.xlu0 %v2103_v47 }
 0x95f   : > { %v2114_v63 = vpop.xlane.xlu1 %2113 }
 0x960   : > { %v2122_v59 = vmul.f32 0.03125, %v2114_v63 }
 0x962   : > { %v3897_v23 = vsub.f32 %v2098_v48, %v2122_v59 }
 0x963   : > { %v2108_v53 = vpop.xlane.xlu1 %2107  ;;  %v2117_v41 = vpop.xlane.xlu0 %2116 }
 0x964   : > { %v2120_v36 = vmul.f32 0.03125, %v2108_v53  ;;  %v2123_v29 = vmul.f32 0.03125, %v2117_v41  ;;  %v2134_v54 = vmul.f32 %v3897_v23, %v3897_v23 }
 0x966   : > { %v3901_v39 = vsub.f32 %v2096_v33, %v2120_v36  ;;  %v2129_v44 = vsub.f32 %v2099_v51, %v2123_v29  ;;  %v2148_v4 = vsel %vm580_vm1, %v2134_v54, 0.0 }
 0x967   : > { %2149 = vadd.xlane.f32.xlu1 %v2148_v4  ;;  %v2102_v7 = vpop.xlane.xlu1 %2101  ;;  %v2111_v8 = vpop.xlane.xlu0 %2110 }
 0x968   : > { %v2118_v22 = vmul.f32 0.03125, %v2102_v7  ;;  %v2121_v14 = vmul.f32 0.03125, %v2111_v8  ;;  %v2132_v21 = vmul.f32 %v3901_v39, %v3901_v39  ;;  %v2135_v9 = vmul.f32 %v2129_v44, %v2129_v44 }
 0x96a   : > { %v3906_v31 = vsub.f32 %v2094_v58, %v2118_v22  ;;  %v2127_v52 = vsub.f32 %v2097_v5, %v2121_v14  ;;  %v2142_v18 = vsel %vm580_vm1, %v2132_v21, 0.0  ;;  %v2151_v15 = vsel %vm580_vm1, %v2135_v9, 0.0 }
 0x96b   : > { %2143 = vadd.xlane.f32.xlu1 %v2142_v18  ;;  %2152 = vadd.xlane.f32.xlu0 %v2151_v15  ;;  %v2105_v6 = vpop.xlane.xlu0 %2104  ;;  %v2181_v58 = vrot.slane %v3775_v3, %v2180_v13  ;;  %v2982_v15 = vld [vmem:[%s518_s29 + $0x8] sm:$0xff]  }
 0x96c   : > { %v2119_v20 = vmul.f32 0.03125, %v2105_v6  ;;  %v2130_v56 = vmul.f32 %v3906_v31, %v3906_v31  ;;  %v2133_v16 = vmul.f32 %v2127_v52, %v2127_v52  ;;  %v2983_v6 = vld [vmem:[%s518_s29] sm:$0xff]  }
 0x96e   : > { %v2125_v45 = vsub.f32 %v2095_v61, %v2119_v20  ;;  %v2136_v32 = vsel %vm580_vm1, %v2130_v56, 0.0  ;;  %v2145_v28 = vsel %vm580_vm1, %v2133_v16, 0.0  ;;  %v2191_v61 = vrot.slane %v3775_v3, %v2190_v46 }
 0x96f   : > { %2137 = vadd.xlane.f32.xlu1 %v2136_v32  ;;  %2146 = vadd.xlane.f32.xlu0 %v2145_v28  ;;  %v2202_v3 = vmul.u32 24, %v3767_v37 }
 0x970   : > { %v2131_v30 = vmul.f32 %v2125_v45, %v2125_v45 }
 0x972   : > { %v2139_v57 = vsel %vm580_vm1, %v2131_v30, 0.0 }
 0x973   : > { %2140 = vadd.xlane.f32.xlu0 %v2139_v57 }
 0x9f0   : > { %v2150_v34 = vpop.xlane.xlu1 %2149 }
 0x9f1   : > { %v2158_v50 = vmul.f32 0.03125, %v2150_v34 }
 0x9f3   : > { %v2164_v38 = vadd.f32 1e-05, %v2158_v50 }
 0x9f4   : > { %v2144_v40 = vpop.xlane.xlu1 %2143  ;;  %v2153_v55 = vpop.xlane.xlu0 %2152 }
 0x9f5   : > { %v2156_v12 = vmul.f32 0.03125, %v2144_v40  ;;  %v2159_v24 = vmul.f32 0.03125, %v2153_v55  ;;  %3092 = vrsqrt.f32 %v2164_v38 }
 0x9f7   : > { %v2162_v43 = vadd.f32 1e-05, %v2156_v12  ;;  %v2165_v27 = vadd.f32 1e-05, %v2159_v24 }
 0x9f8   : > { %v2138_v60 = vpop.xlane.xlu1 %2137  ;;  %v2147_v35 = vpop.xlane.xlu0 %2146 }
 0x9f9   : > { %3094 = vrsqrt.f32 %v2162_v43  ;;  %v2154_v11 = vmul.f32 0.03125, %v2138_v60  ;;  %v2157_v48 = vmul.f32 0.03125, %v2147_v35 }
 0x9fa   : > { %3096 = vrsqrt.f32 %v2165_v27 }
 0x9fb   : > { %v2160_v2 = vadd.f32 1e-05, %v2154_v11  ;;  %v2163_v42 = vadd.f32 1e-05, %v2157_v48 }
 0x9fc   : > { %v2141_v33 = vpop.xlane.xlu0 %2140 }
 0x9fd   : > { %3098 = vrsqrt.f32 %v2160_v2  ;;  %v2155_v49 = vmul.f32 0.03125, %v2141_v33 }
 0x9fe   : > { %3100 = vrsqrt.f32 %v2163_v42 }
 0x9ff   : > { %v2161_v19 = vadd.f32 1e-05, %v2155_v49 }
 0xa01   : > { %3102 = vrsqrt.f32 %v2161_v19 }
 0xa02   : > { %v3093_v62 = vpop.eup %3092 }
 0xa03   : > { %v2176_v17 = vmul.f32 %v3093_v62, %v3897_v23 }
 0xa05   : > { %v2186_v47 = vmul.f32 %v2181_v58, %v2176_v17 }
 0xa06   : > { %v3095_v51 = vpop.eup %3094 }
 0xa07   : > { %v3097_v10 = vpop.eup %3096  ;;  %v2174_v63 = vmul.f32 %v3095_v51, %v3901_v39  ;;  %v2196_v29 = vadd.f32 %v2191_v61, %v2186_v47 }
 0xa08   : > { %v2177_v5 = vmul.f32 %v3097_v10, %v2129_v44  ;;  %v2199_v44 = vand.u32 127, %v1716_v1 }
 0xa09   : > { %v2184_v4 = vmul.f32 %v2181_v58, %v2174_v63 }
 0xa0a   : > { %v3099_v26 = vpop.eup %3098  ;;  %v2187_v25 = vmul.f32 %v2181_v58, %v2177_v5  ;;  %vm2203_vm7 = vcmp.eq.s32.totalorder %v2199_v44, %v2202_v3 }
 0xa0b   : > { %v3101_v59 = vpop.eup %3100  ;;  %v2172_v7 = vmul.f32 %v3099_v26, %v3906_v31  ;;  %v2194_v22 = vadd.f32 %v2191_v61, %v2184_v4  ;;  %v2575_v37 = vsel %vm2203_vm7, 1.0, %v3122_v0 }
 0xa0c   : > { %v2197_v53 = vadd.f32 %v2191_v61, %v2187_v25  ;;  %v2175_v41 = vmul.f32 %v3101_v59, %v2127_v52 }
 0xa0d   : > { %v2182_v14 = vmul.f32 %v2181_v58, %v2172_v7 }
 0xa0e   : > { %v3103_v36 = vpop.eup %3102  ;;  %2880 = vmatpush3.msra.mxu0 %v2197_v53  ;;  %v2185_v54 = vmul.f32 %v2181_v58, %v2175_v41 }
 0xa0f   : > { %2881 = vmatprep.subr.mxu0 %v3122_v0  ;;  %v2173_v23 = vmul.f32 %v3103_v36, %v2125_v45  ;;  %v2192_v1 = vadd.f32 %v2191_v61, %v2182_v14 }
 0xa10   : > { %2882 = vmatpush3.msra.mxu0 %v2196_v29  ;;  %v2195_v8 = vadd.f32 %v2191_v61, %v2185_v54 }
 0xa11   : > { %2883 = vmatprep.subr.mxu0 %v3122_v0  ;;  %v2183_v39 = vmul.f32 %v2181_v58, %v2173_v23 }
 0xa12   : > { %2884 = vmatpush3.msra.mxu0 %v2195_v8 }
 0xa13   : > { %2885 = vmatprep.subr.mxu0 %v3122_v0  ;;  %v2193_v21 = vadd.f32 %v2191_v61, %v2183_v39 }
 0xa14   : > { %2886 = vmatpush3.msra.mxu0 %v2194_v22 }
 0xa15   : > { %2887 = vmatprep.subr.mxu0 %v3122_v0 }
 0xa16   : > { %2888 = vmatpush3.msra.mxu0 %v2193_v21 }
 0xa17   : > { %2889 = vmatprep.subr.mxu0 %v3122_v0 }
 0xa18   : > { %2890 = vmatpush3.msra.mxu0 %v2192_v1 }
 0xa19   : > { %2892 = vmatmul.mubr.msk.f32.vlgmr.msra.gmra.mxu0 %vm747_vm3, %v2575_v37  ;;  %2894 = vmatprep.subr.bf16.mxu0 %v3122_v0 }
 0xa1a   : > { %2898 = vmatprep.mubr.msk.bf16.mxu0 %vm3123_vm0, %v3122_v0  ;;  %2895 = vmatpush3.bf16.msra.mxu0 %v2982_v15 }
 0xa1b   : > { %2896 = vmatprep.subr.bf16.mxu0 %v3122_v0 }
 0xa1e   : > { %2897 = vmatpush3.bf16.msra.mxu0 %v2983_v6 }
 0xad9   : > { %v2275_v9 = vpop.f32.mrf.mxu0 }
 0xada   : > { %v2279_v31 = vmul.f32 %v2275_v9, %v2275_v9 }
 0xadb   : > { %v2893_v52 = vpop.f32.mrf.mxu0 }
 0xadc   : > { %v2280_v18 = vsel %vm580_vm1, %v2279_v31, 0.0 }
 0xadd   : > { %2281 = vadd.xlane.f32.xlu0 %v2280_v18 }
 0xb66   : > { %v2282_v20 = vpop.xlane.xlu0 %2281 }
 0xb67   : > { %v2283_v56 = vadd.f32 1e-12, %v2282_v20 }
 0xb69   : > { %3104 = vrsqrt.f32 %v2283_v56 }
 0xb76   : > { %v3105_v16 = vpop.eup %3104 }
 0xb77   : > { %v2285_v45 = vmul.f32 %v3105_v16, %v2275_v9 }
 0xb79   : > { %v2286_v32 = vpack.c.bf16 %v2285_v45, %v2285_v45 }
 0xb7b   : > { %2899 = vmatmul.mubr.msk.bf16.vlgmr.msra.gmra.mxu0 %vm580_vm1, %v2286_v32 }
 0xc3b   : > { %v2340_v28 = vpop.f32.mrf.mxu0 }
 0xc3c   : > { %v2346_v30 = vmul.f32 %v2340_v28, %v2340_v28 }
 0xc3d   : > { %v2900_v57 = vpop.f32.mrf.mxu0 }
 0xc3e   : > { %2347 = vadd.xlane.f32.xlu1 %v2346_v30 }
 0xc3f   : > { %v2343_v34 = vpop.f32.mrf.mxu0 }
 0xc41   : > { %v2901_v50 = vpop.f32.mrf.mxu0 }
 0xcc7   : > { %v2348_v38 = vpop.xlane.xlu1 %2347 }
 0xcc8   : > { %v2349_v40 = vadd.f32 1e-12, %v2348_v38 }
 0xcca   : > { %3106 = vrsqrt.f32 %v2349_v40 }
 0xcd7   : > { %v3107_v0 = vpop.eup %3106 }
 0xcd8   : > { %v2351_v55 = vmul.f32 %v3107_v0, %v2340_v28 }
 0xcda   : > { %2352 = vst [vmem:[%s522_s12] sm:$0xff] %v2351_v55 }
 0xcdb PF: > { %s20_s13 = sadd.s32 1, %s3120_s13  }
 0xcdc   : > { %p17_p4 = scmp.ge.s32.totalorder %s20_s13, 4  }
 0xcde   :  { %19 = sbr.rel (!%p17_p4) target bundleno = 1 (0x1), region = 117 }

</bundles_post_ra>
